<compile_context>
chip_gen: v6e
topology: v6e:2x2x1
jax: 0.10.0
libtpu: 0.0.40
codegen_flags: <defaults>
</compile_context>

<pallas_src>
import jax
import jax.numpy as jnp
from jax.experimental import pallas as pl
from jax.experimental.pallas import tpu as pltpu

BN_EPS = 1e-5


def _bn_train(x, gamma=None, beta=None):
    """PyTorch BatchNorm1d in training mode: batch mean, biased var, eps=1e-5."""
    mu = jnp.mean(x, axis=0, keepdims=True)
    var = jnp.mean((x - mu) ** 2, axis=0, keepdims=True)
    y = (x - mu) * jax.lax.rsqrt(var + BN_EPS)
    if gamma is not None:
        y = y * gamma + beta
    return y


def _make_fused_kernel(B, HW):
    """Fused per-view kernel: synthetic backbone + pool + projection + prediction."""

    def kernel(x_ref, wstem_ref,
               w1_ref, g1_ref, b1_ref,
               w2_ref, g2_ref, b2_ref,
               w3_ref,
               w4_ref, g4_ref, b4_ref,
               w5_ref, b5_ref,
               z_ref, p_ref):
        # ---- synthetic backbone stem (1x1 conv as matmul) + ReLU --------------
        # x_ref: [C, B*HW] (spatial-last, lane-dense), wstem_ref: [num_prev, C]
        h = jnp.maximum(
            jnp.dot(wstem_ref[...], x_ref[...],
                    preferred_element_type=jnp.float32),
            0.0)                                               # [P, B*HW]

        # ---- global average pool: per-image mean over lane-aligned slices ----
        cols = [jnp.mean(h[:, b * HW:(b + 1) * HW], axis=1, keepdims=True)
                for b in range(B)]                             # B x [P, 1]
        f = jnp.concatenate(cols, axis=1).T                    # [B, P]

        # ---- projection_mlp ---------------------------------------------------
        a = jnp.dot(f, w1_ref[...], preferred_element_type=jnp.float32)
        a = jnp.maximum(_bn_train(a, g1_ref[...], b1_ref[...]), 0.0)
        a = jnp.dot(a, w2_ref[...], preferred_element_type=jnp.float32)
        a = jnp.maximum(_bn_train(a, g2_ref[...], b2_ref[...]), 0.0)
        a = jnp.dot(a, w3_ref[...], preferred_element_type=jnp.float32)
        z = _bn_train(a)                      # BatchNorm1d(num_features, affine=False)
        z_ref[...] = z

        # ---- prediction_mlp ---------------------------------------------------
        q = jnp.dot(z, w4_ref[...], preferred_element_type=jnp.float32)
        q = jnp.maximum(_bn_train(q, g4_ref[...], b4_ref[...]), 0.0)
        p_ref[...] = (jnp.dot(q, w5_ref[...], preferred_element_type=jnp.float32)
                      + b5_ref[...])

    return kernel


def simsiam_forward(x01, params):
    """x01: [B, 2, C, H, W] -> (z0, z1, p0, p1), each [B, num_features]."""
    B, V, C, H, W = x01.shape
    assert V == 2
    HW = H * W
    P = params["w_stem"].shape[0]       # num_prev
    F = params["w3"].shape[1]           # num_features
    N = params["w4"].shape[1]           # num_neck

    # Layout glue (outside kernel): [B, 2, C, H, W] -> [2, C, B*HW] (spatial last).
    x_views = jnp.transpose(x01, (1, 2, 0, 3, 4)).reshape(2, C, B * HW)

    def full(arr):
        nd = arr.ndim
        return pl.BlockSpec(arr.shape, lambda i, _nd=nd: (0,) * _nd)

    in_specs = [
        pl.BlockSpec((None, C, B * HW), lambda i: (i, 0, 0)),   # x, per view
        full(params["w_stem"]),
        full(params["w1"]), full(params["g1"]), full(params["b1"]),
        full(params["w2"]), full(params["g2"]), full(params["b2"]),
        full(params["w3"]),
        full(params["w4"]), full(params["g4"]), full(params["b4"]),
        full(params["w5"]), full(params["b5"]),
    ]
    out_specs = (pl.BlockSpec((None, B, F), lambda i: (i, 0, 0)),
                 pl.BlockSpec((None, B, F), lambda i: (i, 0, 0)))
    out_shape = (jax.ShapeDtypeStruct((2, B, F), jnp.float32),
                 jax.ShapeDtypeStruct((2, B, F), jnp.float32))

    # Advisory cost estimate so XLA can overlap neighbouring ops with the call.
    flops = 2 * (2 * P * C * B * HW
                 + 2 * B * (P * P + P * P + P * F + F * N + N * F))
    transcendentals = 2 * (P + P + F + N + F)          # rsqrt per BN feature/view
    bytes_accessed = 4 * (x_views.size
                          + sum(int(v.size) for v in params.values())
                          + 2 * 2 * B * F)
    cost = pl.CostEstimate(flops=int(flops),
                           transcendentals=int(transcendentals),
                           bytes_accessed=int(bytes_accessed))

    z, p = pl.pallas_call(
        _make_fused_kernel(B, HW),
        out_shape=out_shape,
        grid=(2,),
        in_specs=in_specs,
        out_specs=out_specs,
        compiler_params=pltpu.CompilerParams(
            dimension_semantics=("parallel",)),
        cost_estimate=cost,
    )(x_views, params["w_stem"],
      params["w1"], params["g1"], params["b1"],
      params["w2"], params["g2"], params["b2"],
      params["w3"],
      params["w4"], params["g4"], params["b4"],
      params["w5"], params["b5"])

    return z[0], z[1], p[0], p[1]


# --------------------------------------------------------------------------
# Deterministic parameter construction (PyTorch-default-style init).
#   w_stem is kept in PyTorch [out, in] orientation ([num_prev, C]).
#   MLP Linear weights are created as [out, in] then transposed to [in, out]
#   so the kernel computes y = x @ W (== PyTorch x @ W.T).
#   BatchNorm gamma=1, beta=0 (PyTorch default).
# --------------------------------------------------------------------------
def make_params(key, c_in, num_prev, num_features, num_neck):
    ks = jax.random.split(key, 6)

    def lin(k, out_dim, in_dim, transpose=True):
        bound = 1.0 / jnp.sqrt(in_dim)
        w = jax.random.uniform(k, (out_dim, in_dim), jnp.float32, -bound, bound)
        return jnp.transpose(w) if transpose else w

    return {
        "w_stem": lin(ks[0], num_prev, c_in, transpose=False),  # [prev, c_in]
        "w1": lin(ks[1], num_prev, num_prev),                   # [prev, prev]
        "g1": jnp.ones((1, num_prev), jnp.float32),
        "b1": jnp.zeros((1, num_prev), jnp.float32),
        "w2": lin(ks[2], num_prev, num_prev),                   # [prev, prev]
        "g2": jnp.ones((1, num_prev), jnp.float32),
        "b2": jnp.zeros((1, num_prev), jnp.float32),
        "w3": lin(ks[3], num_features, num_prev),               # [prev, feat]
        "w4": lin(ks[4], num_neck, num_features),               # [feat, neck]
        "g4": jnp.ones((1, num_neck), jnp.float32),
        "b4": jnp.zeros((1, num_neck), jnp.float32),
        "w5": lin(ks[5], num_features, num_neck),               # [neck, feat]
        "b5": jnp.zeros((1, num_features), jnp.float32),
    }


if __name__ == "__main__":
    B, C, H, W = 4, 4, 16, 16
    NUM_PREV, NUM_FEATURES, NUM_NECK = 128, 128, 64

    key = jax.random.PRNGKey(0)
    k_x, k_p = jax.random.split(key)
    x01 = jax.random.normal(k_x, (B, 2, C, H, W), jnp.float32)
    params = make_params(k_p, C, NUM_PREV, NUM_FEATURES, NUM_NECK)

    fwd = jax.jit(lambda x: simsiam_forward(x, params))
    z0, z1, p0, p1 = fwd(x01)
    jax.block_until_ready((z0, z1, p0, p1))

    assert z0.shape == (B, NUM_FEATURES) and z1.shape == (B, NUM_FEATURES)
    assert p0.shape == (B, NUM_FEATURES) and p1.shape == (B, NUM_FEATURES)
    assert all(bool(jnp.isfinite(t).all()) for t in (z0, z1, p0, p1))
    print("KERNEL_OK")
</pallas_src>

<mosaic_0001>
module attributes {stable_mosaic.version = 11 : i64} {
  func.func @kernel(%arg0: i32, %arg1: memref<1x4x1024xf32, #tpu.memory_space<vmem>>, %arg2: memref<128x4xf32, #tpu.memory_space<vmem>>, %arg3: memref<128x128xf32, #tpu.memory_space<vmem>>, %arg4: memref<1x128xf32, #tpu.memory_space<vmem>>, %arg5: memref<1x128xf32, #tpu.memory_space<vmem>>, %arg6: memref<128x128xf32, #tpu.memory_space<vmem>>, %arg7: memref<1x128xf32, #tpu.memory_space<vmem>>, %arg8: memref<1x128xf32, #tpu.memory_space<vmem>>, %arg9: memref<128x128xf32, #tpu.memory_space<vmem>>, %arg10: memref<128x64xf32, #tpu.memory_space<vmem>>, %arg11: memref<1x64xf32, #tpu.memory_space<vmem>>, %arg12: memref<1x64xf32, #tpu.memory_space<vmem>>, %arg13: memref<64x128xf32, #tpu.memory_space<vmem>>, %arg14: memref<1x128xf32, #tpu.memory_space<vmem>>, %arg15: memref<1x4x128xf32, #tpu.memory_space<vmem>>, %arg16: memref<1x4x128xf32, #tpu.memory_space<vmem>>) attributes {dimension_semantics = [#tpu.dimension_semantics<parallel>], iteration_bounds = array<i64: 2>, scalar_prefetch = 0 : i64, scratch_operands = 0 : i64, tpu.core_type = #tpu.core_type<tc>, window_params = [{transform_indices = @transform_0, window_bounds = array<i64: 1, 4, 1024>}, {pipeline_mode = #tpu.pipeline_mode<synchronous>, transform_indices = @transform_1, window_bounds = array<i64: 128, 4>}, {pipeline_mode = #tpu.pipeline_mode<synchronous>, transform_indices = @transform_2, window_bounds = array<i64: 128, 128>}, {pipeline_mode = #tpu.pipeline_mode<synchronous>, transform_indices = @transform_3, window_bounds = array<i64: 1, 128>}, {pipeline_mode = #tpu.pipeline_mode<synchronous>, transform_indices = @transform_4, window_bounds = array<i64: 1, 128>}, {pipeline_mode = #tpu.pipeline_mode<synchronous>, transform_indices = @transform_5, window_bounds = array<i64: 128, 128>}, {pipeline_mode = #tpu.pipeline_mode<synchronous>, transform_indices = @transform_6, window_bounds = array<i64: 1, 128>}, {pipeline_mode = #tpu.pipeline_mode<synchronous>, transform_indices = @transform_7, window_bounds = array<i64: 1, 128>}, {pipeline_mode = #tpu.pipeline_mode<synchronous>, transform_indices = @transform_8, window_bounds = array<i64: 128, 128>}, {pipeline_mode = #tpu.pipeline_mode<synchronous>, transform_indices = @transform_9, window_bounds = array<i64: 128, 64>}, {pipeline_mode = #tpu.pipeline_mode<synchronous>, transform_indices = @transform_10, window_bounds = array<i64: 1, 64>}, {pipeline_mode = #tpu.pipeline_mode<synchronous>, transform_indices = @transform_11, window_bounds = array<i64: 1, 64>}, {pipeline_mode = #tpu.pipeline_mode<synchronous>, transform_indices = @transform_12, window_bounds = array<i64: 64, 128>}, {pipeline_mode = #tpu.pipeline_mode<synchronous>, transform_indices = @transform_13, window_bounds = array<i64: 1, 128>}, {transform_indices = @transform_14, window_bounds = array<i64: 1, 4, 128>}, {transform_indices = @transform_15, window_bounds = array<i64: 1, 4, 128>}]} {
    %c0 = arith.constant 0 : index
    %c0_0 = arith.constant 0 : index
    %0 = vector.load %arg2[%c0, %c0_0] : memref<128x4xf32, #tpu.memory_space<vmem>>, vector<128x4xf32>
    %c0_1 = arith.constant 0 : index
    %c0_2 = arith.constant 0 : index
    %c0_3 = arith.constant 0 : index
    %1 = vector.load %arg1[%c0_1, %c0_2, %c0_3] : memref<1x4x1024xf32, #tpu.memory_space<vmem>>, vector<1x4x1024xf32>
    %2 = vector.shape_cast %1 : vector<1x4x1024xf32> to vector<4x1024xf32>
    %cst = arith.constant dense<0.000000e+00> : vector<128x1024xf32>
    %3 = tpu.matmul %0, %2, %cst {dimension_numbers = #tpu.dot_dimension_numbers<[1], [0], [0], [1], [0, 0, 1, 1], [], []>} : vector<128x4xf32>, vector<4x1024xf32>, vector<128x1024xf32> -> vector<128x1024xf32>
    %cst_4 = arith.constant 0.000000e+00 : f32
    %4 = vector.broadcast %cst_4 : f32 to vector<128x1024xf32>
    %5 = arith.maximumf %3, %4 : vector<128x1024xf32>
    %6 = vector.extract_strided_slice %5 {offsets = [0, 0], sizes = [128, 256], strides = [1, 1]} : vector<128x1024xf32> to vector<128x256xf32>
    %cst_5 = arith.constant dense<0.000000e+00> : vector<128xf32>
    %7 = vector.multi_reduction <add>, %6, %cst_5 [1] : vector<128x256xf32> to vector<128xf32>
    %8 = vector.shape_cast %7 : vector<128xf32> to vector<128x1xf32>
    %cst_6 = arith.constant 2.560000e+02 : f32
    %9 = vector.broadcast %cst_6 : f32 to vector<128x1xf32>
    %10 = arith.divf %8, %9 : vector<128x1xf32>
    %11 = vector.extract_strided_slice %5 {offsets = [0, 256], sizes = [128, 256], strides = [1, 1]} : vector<128x1024xf32> to vector<128x256xf32>
    %cst_7 = arith.constant dense<0.000000e+00> : vector<128xf32>
    %12 = vector.multi_reduction <add>, %11, %cst_7 [1] : vector<128x256xf32> to vector<128xf32>
    %13 = vector.shape_cast %12 : vector<128xf32> to vector<128x1xf32>
    %cst_8 = arith.constant 2.560000e+02 : f32
    %14 = vector.broadcast %cst_8 : f32 to vector<128x1xf32>
    %15 = arith.divf %13, %14 : vector<128x1xf32>
    %16 = vector.extract_strided_slice %5 {offsets = [0, 512], sizes = [128, 256], strides = [1, 1]} : vector<128x1024xf32> to vector<128x256xf32>
    %cst_9 = arith.constant dense<0.000000e+00> : vector<128xf32>
    %17 = vector.multi_reduction <add>, %16, %cst_9 [1] : vector<128x256xf32> to vector<128xf32>
    %18 = vector.shape_cast %17 : vector<128xf32> to vector<128x1xf32>
    %cst_10 = arith.constant 2.560000e+02 : f32
    %19 = vector.broadcast %cst_10 : f32 to vector<128x1xf32>
    %20 = arith.divf %18, %19 : vector<128x1xf32>
    %21 = vector.extract_strided_slice %5 {offsets = [0, 768], sizes = [128, 256], strides = [1, 1]} : vector<128x1024xf32> to vector<128x256xf32>
    %cst_11 = arith.constant dense<0.000000e+00> : vector<128xf32>
    %22 = vector.multi_reduction <add>, %21, %cst_11 [1] : vector<128x256xf32> to vector<128xf32>
    %23 = vector.shape_cast %22 : vector<128xf32> to vector<128x1xf32>
    %cst_12 = arith.constant 2.560000e+02 : f32
    %24 = vector.broadcast %cst_12 : f32 to vector<128x1xf32>
    %25 = arith.divf %23, %24 : vector<128x1xf32>
    %26 = tpu.concatenate %10, %15, %20, %25 in 1 : vector<128x1xf32>, vector<128x1xf32>, vector<128x1xf32>, vector<128x1xf32> -> vector<128x4xf32>
    %27 = tpu.transpose %26, [1, 0] : vector<128x4xf32> -> vector<4x128xf32>
    %c0_13 = arith.constant 0 : index
    %c0_14 = arith.constant 0 : index
    %28 = vector.load %arg3[%c0_13, %c0_14] : memref<128x128xf32, #tpu.memory_space<vmem>>, vector<128x128xf32>
    %cst_15 = arith.constant dense<0.000000e+00> : vector<4x128xf32>
    %29 = tpu.matmul %27, %28, %cst_15 {dimension_numbers = #tpu.dot_dimension_numbers<[1], [0], [0], [1], [0, 0, 1, 1], [], []>} : vector<4x128xf32>, vector<128x128xf32>, vector<4x128xf32> -> vector<4x128xf32>
    %c0_16 = arith.constant 0 : index
    %c0_17 = arith.constant 0 : index
    %30 = vector.load %arg4[%c0_16, %c0_17] : memref<1x128xf32, #tpu.memory_space<vmem>>, vector<1x128xf32>
    %c0_18 = arith.constant 0 : index
    %c0_19 = arith.constant 0 : index
    %31 = vector.load %arg5[%c0_18, %c0_19] : memref<1x128xf32, #tpu.memory_space<vmem>>, vector<1x128xf32>
    %cst_20 = arith.constant dense<0.000000e+00> : vector<128xf32>
    %32 = vector.multi_reduction <add>, %29, %cst_20 [0] : vector<4x128xf32> to vector<128xf32>
    %33 = vector.shape_cast %32 : vector<128xf32> to vector<1x128xf32>
    %cst_21 = arith.constant 4.000000e+00 : f32
    %34 = vector.broadcast %cst_21 : f32 to vector<1x128xf32>
    %35 = arith.divf %33, %34 : vector<1x128xf32>
    %36 = vector.broadcast %35 : vector<1x128xf32> to vector<4x128xf32>
    %37 = arith.subf %29, %36 : vector<4x128xf32>
    %38 = arith.mulf %37, %37 : vector<4x128xf32>
    %cst_22 = arith.constant dense<0.000000e+00> : vector<128xf32>
    %39 = vector.multi_reduction <add>, %38, %cst_22 [0] : vector<4x128xf32> to vector<128xf32>
    %40 = vector.shape_cast %39 : vector<128xf32> to vector<1x128xf32>
    %cst_23 = arith.constant 4.000000e+00 : f32
    %41 = vector.broadcast %cst_23 : f32 to vector<1x128xf32>
    %42 = arith.divf %40, %41 : vector<1x128xf32>
    %43 = vector.broadcast %35 : vector<1x128xf32> to vector<4x128xf32>
    %44 = arith.subf %29, %43 : vector<4x128xf32>
    %cst_24 = arith.constant 9.99999974E-6 : f32
    %45 = vector.broadcast %cst_24 : f32 to vector<1x128xf32>
    %46 = arith.addf %42, %45 : vector<1x128xf32>
    %47 = math.rsqrt %46 : vector<1x128xf32>
    %48 = vector.broadcast %47 : vector<1x128xf32> to vector<4x128xf32>
    %49 = arith.mulf %44, %48 : vector<4x128xf32>
    %50 = vector.broadcast %30 : vector<1x128xf32> to vector<4x128xf32>
    %51 = arith.mulf %49, %50 : vector<4x128xf32>
    %52 = vector.broadcast %31 : vector<1x128xf32> to vector<4x128xf32>
    %53 = arith.addf %51, %52 : vector<4x128xf32>
    %cst_25 = arith.constant 0.000000e+00 : f32
    %54 = vector.broadcast %cst_25 : f32 to vector<4x128xf32>
    %55 = arith.maximumf %53, %54 : vector<4x128xf32>
    %c0_26 = arith.constant 0 : index
    %c0_27 = arith.constant 0 : index
    %56 = vector.load %arg6[%c0_26, %c0_27] : memref<128x128xf32, #tpu.memory_space<vmem>>, vector<128x128xf32>
    %cst_28 = arith.constant dense<0.000000e+00> : vector<4x128xf32>
    %57 = tpu.matmul %55, %56, %cst_28 {dimension_numbers = #tpu.dot_dimension_numbers<[1], [0], [0], [1], [0, 0, 1, 1], [], []>} : vector<4x128xf32>, vector<128x128xf32>, vector<4x128xf32> -> vector<4x128xf32>
    %c0_29 = arith.constant 0 : index
    %c0_30 = arith.constant 0 : index
    %58 = vector.load %arg7[%c0_29, %c0_30] : memref<1x128xf32, #tpu.memory_space<vmem>>, vector<1x128xf32>
    %c0_31 = arith.constant 0 : index
    %c0_32 = arith.constant 0 : index
    %59 = vector.load %arg8[%c0_31, %c0_32] : memref<1x128xf32, #tpu.memory_space<vmem>>, vector<1x128xf32>
    %cst_33 = arith.constant dense<0.000000e+00> : vector<128xf32>
    %60 = vector.multi_reduction <add>, %57, %cst_33 [0] : vector<4x128xf32> to vector<128xf32>
    %61 = vector.shape_cast %60 : vector<128xf32> to vector<1x128xf32>
    %cst_34 = arith.constant 4.000000e+00 : f32
    %62 = vector.broadcast %cst_34 : f32 to vector<1x128xf32>
    %63 = arith.divf %61, %62 : vector<1x128xf32>
    %64 = vector.broadcast %63 : vector<1x128xf32> to vector<4x128xf32>
    %65 = arith.subf %57, %64 : vector<4x128xf32>
    %66 = arith.mulf %65, %65 : vector<4x128xf32>
    %cst_35 = arith.constant dense<0.000000e+00> : vector<128xf32>
    %67 = vector.multi_reduction <add>, %66, %cst_35 [0] : vector<4x128xf32> to vector<128xf32>
    %68 = vector.shape_cast %67 : vector<128xf32> to vector<1x128xf32>
    %cst_36 = arith.constant 4.000000e+00 : f32
    %69 = vector.broadcast %cst_36 : f32 to vector<1x128xf32>
    %70 = arith.divf %68, %69 : vector<1x128xf32>
    %71 = vector.broadcast %63 : vector<1x128xf32> to vector<4x128xf32>
    %72 = arith.subf %57, %71 : vector<4x128xf32>
    %cst_37 = arith.constant 9.99999974E-6 : f32
    %73 = vector.broadcast %cst_37 : f32 to vector<1x128xf32>
    %74 = arith.addf %70, %73 : vector<1x128xf32>
    %75 = math.rsqrt %74 : vector<1x128xf32>
    %76 = vector.broadcast %75 : vector<1x128xf32> to vector<4x128xf32>
    %77 = arith.mulf %72, %76 : vector<4x128xf32>
    %78 = vector.broadcast %58 : vector<1x128xf32> to vector<4x128xf32>
    %79 = arith.mulf %77, %78 : vector<4x128xf32>
    %80 = vector.broadcast %59 : vector<1x128xf32> to vector<4x128xf32>
    %81 = arith.addf %79, %80 : vector<4x128xf32>
    %cst_38 = arith.constant 0.000000e+00 : f32
    %82 = vector.broadcast %cst_38 : f32 to vector<4x128xf32>
    %83 = arith.maximumf %81, %82 : vector<4x128xf32>
    %c0_39 = arith.constant 0 : index
    %c0_40 = arith.constant 0 : index
    %84 = vector.load %arg9[%c0_39, %c0_40] : memref<128x128xf32, #tpu.memory_space<vmem>>, vector<128x128xf32>
    %cst_41 = arith.constant dense<0.000000e+00> : vector<4x128xf32>
    %85 = tpu.matmul %83, %84, %cst_41 {dimension_numbers = #tpu.dot_dimension_numbers<[1], [0], [0], [1], [0, 0, 1, 1], [], []>} : vector<4x128xf32>, vector<128x128xf32>, vector<4x128xf32> -> vector<4x128xf32>
    %cst_42 = arith.constant dense<0.000000e+00> : vector<128xf32>
    %86 = vector.multi_reduction <add>, %85, %cst_42 [0] : vector<4x128xf32> to vector<128xf32>
    %87 = vector.shape_cast %86 : vector<128xf32> to vector<1x128xf32>
    %cst_43 = arith.constant 4.000000e+00 : f32
    %88 = vector.broadcast %cst_43 : f32 to vector<1x128xf32>
    %89 = arith.divf %87, %88 : vector<1x128xf32>
    %90 = vector.broadcast %89 : vector<1x128xf32> to vector<4x128xf32>
    %91 = arith.subf %85, %90 : vector<4x128xf32>
    %92 = arith.mulf %91, %91 : vector<4x128xf32>
    %cst_44 = arith.constant dense<0.000000e+00> : vector<128xf32>
    %93 = vector.multi_reduction <add>, %92, %cst_44 [0] : vector<4x128xf32> to vector<128xf32>
    %94 = vector.shape_cast %93 : vector<128xf32> to vector<1x128xf32>
    %cst_45 = arith.constant 4.000000e+00 : f32
    %95 = vector.broadcast %cst_45 : f32 to vector<1x128xf32>
    %96 = arith.divf %94, %95 : vector<1x128xf32>
    %97 = vector.broadcast %89 : vector<1x128xf32> to vector<4x128xf32>
    %98 = arith.subf %85, %97 : vector<4x128xf32>
    %cst_46 = arith.constant 9.99999974E-6 : f32
    %99 = vector.broadcast %cst_46 : f32 to vector<1x128xf32>
    %100 = arith.addf %96, %99 : vector<1x128xf32>
    %101 = math.rsqrt %100 : vector<1x128xf32>
    %102 = vector.broadcast %101 : vector<1x128xf32> to vector<4x128xf32>
    %103 = arith.mulf %98, %102 : vector<4x128xf32>
    %c0_47 = arith.constant 0 : index
    %c0_48 = arith.constant 0 : index
    %c0_49 = arith.constant 0 : index
    %104 = vector.load %arg15[%c0_47, %c0_48, %c0_49] : memref<1x4x128xf32, #tpu.memory_space<vmem>>, vector<1x4x128xf32>
    %105 = vector.shape_cast %104 : vector<1x4x128xf32> to vector<4x128xf32>
    %106 = vector.shape_cast %103 : vector<4x128xf32> to vector<1x4x128xf32>
    tpu.vector_store %arg15[%c0_47, %c0_48, %c0_49], %106 {strides = array<i32>} : memref<1x4x128xf32, #tpu.memory_space<vmem>>, vector<1x4x128xf32>,
    %c0_50 = arith.constant 0 : index
    %c0_51 = arith.constant 0 : index
    %107 = vector.load %arg10[%c0_50, %c0_51] : memref<128x64xf32, #tpu.memory_space<vmem>>, vector<128x64xf32>
    %cst_52 = arith.constant dense<0.000000e+00> : vector<4x64xf32>
    %108 = tpu.matmul %103, %107, %cst_52 {dimension_numbers = #tpu.dot_dimension_numbers<[1], [0], [0], [1], [0, 0, 1, 1], [], []>} : vector<4x128xf32>, vector<128x64xf32>, vector<4x64xf32> -> vector<4x64xf32>
    %c0_53 = arith.constant 0 : index
    %c0_54 = arith.constant 0 : index
    %109 = vector.load %arg11[%c0_53, %c0_54] : memref<1x64xf32, #tpu.memory_space<vmem>>, vector<1x64xf32>
    %c0_55 = arith.constant 0 : index
    %c0_56 = arith.constant 0 : index
    %110 = vector.load %arg12[%c0_55, %c0_56] : memref<1x64xf32, #tpu.memory_space<vmem>>, vector<1x64xf32>
    %cst_57 = arith.constant dense<0.000000e+00> : vector<64xf32>
    %111 = vector.multi_reduction <add>, %108, %cst_57 [0] : vector<4x64xf32> to vector<64xf32>
    %112 = vector.shape_cast %111 : vector<64xf32> to vector<1x64xf32>
    %cst_58 = arith.constant 4.000000e+00 : f32
    %113 = vector.broadcast %cst_58 : f32 to vector<1x64xf32>
    %114 = arith.divf %112, %113 : vector<1x64xf32>
    %115 = vector.broadcast %114 : vector<1x64xf32> to vector<4x64xf32>
    %116 = arith.subf %108, %115 : vector<4x64xf32>
    %117 = arith.mulf %116, %116 : vector<4x64xf32>
    %cst_59 = arith.constant dense<0.000000e+00> : vector<64xf32>
    %118 = vector.multi_reduction <add>, %117, %cst_59 [0] : vector<4x64xf32> to vector<64xf32>
    %119 = vector.shape_cast %118 : vector<64xf32> to vector<1x64xf32>
    %cst_60 = arith.constant 4.000000e+00 : f32
    %120 = vector.broadcast %cst_60 : f32 to vector<1x64xf32>
    %121 = arith.divf %119, %120 : vector<1x64xf32>
    %122 = vector.broadcast %114 : vector<1x64xf32> to vector<4x64xf32>
    %123 = arith.subf %108, %122 : vector<4x64xf32>
    %cst_61 = arith.constant 9.99999974E-6 : f32
    %124 = vector.broadcast %cst_61 : f32 to vector<1x64xf32>
    %125 = arith.addf %121, %124 : vector<1x64xf32>
    %126 = math.rsqrt %125 : vector<1x64xf32>
    %127 = vector.broadcast %126 : vector<1x64xf32> to vector<4x64xf32>
    %128 = arith.mulf %123, %127 : vector<4x64xf32>
    %129 = vector.broadcast %109 : vector<1x64xf32> to vector<4x64xf32>
    %130 = arith.mulf %128, %129 : vector<4x64xf32>
    %131 = vector.broadcast %110 : vector<1x64xf32> to vector<4x64xf32>
    %132 = arith.addf %130, %131 : vector<4x64xf32>
    %cst_62 = arith.constant 0.000000e+00 : f32
    %133 = vector.broadcast %cst_62 : f32 to vector<4x64xf32>
    %134 = arith.maximumf %132, %133 : vector<4x64xf32>
    %c0_63 = arith.constant 0 : index
    %c0_64 = arith.constant 0 : index
    %135 = vector.load %arg13[%c0_63, %c0_64] : memref<64x128xf32, #tpu.memory_space<vmem>>, vector<64x128xf32>
    %cst_65 = arith.constant dense<0.000000e+00> : vector<4x128xf32>
    %136 = tpu.matmul %134, %135, %cst_65 {dimension_numbers = #tpu.dot_dimension_numbers<[1], [0], [0], [1], [0, 0, 1, 1], [], []>} : vector<4x64xf32>, vector<64x128xf32>, vector<4x128xf32> -> vector<4x128xf32>
    %c0_66 = arith.constant 0 : index
    %c0_67 = arith.constant 0 : index
    %137 = vector.load %arg14[%c0_66, %c0_67] : memref<1x128xf32, #tpu.memory_space<vmem>>, vector<1x128xf32>
    %138 = vector.broadcast %137 : vector<1x128xf32> to vector<4x128xf32>
    %139 = arith.addf %136, %138 : vector<4x128xf32>
    %c0_68 = arith.constant 0 : index
    %c0_69 = arith.constant 0 : index
    %c0_70 = arith.constant 0 : index
    %140 = vector.load %arg16[%c0_68, %c0_69, %c0_70] : memref<1x4x128xf32, #tpu.memory_space<vmem>>, vector<1x4x128xf32>
    %141 = vector.shape_cast %140 : vector<1x4x128xf32> to vector<4x128xf32>
    %142 = vector.shape_cast %139 : vector<4x128xf32> to vector<1x4x128xf32>
    tpu.vector_store %arg16[%c0_68, %c0_69, %c0_70], %142 {strides = array<i32>} : memref<1x4x128xf32, #tpu.memory_space<vmem>>, vector<1x4x128xf32>,
    return
  }
  func.func @transform_0(%arg0: i32) -> (i32, i32, i32) {
    %c0_i32 = arith.constant 0 : i32
    %c0_i32_0 = arith.constant 0 : i32
    %c0_i32_1 = arith.constant 0 : i32
    return %arg0, %c0_i32, %c0_i32_0 : i32, i32, i32
  }
  func.func @transform_1(%arg0: i32) -> (i32, i32) {
    %c0_i32 = arith.constant 0 : i32
    %c0_i32_0 = arith.constant 0 : i32
    %c0_i32_1 = arith.constant 0 : i32
    return %c0_i32, %c0_i32_0 : i32, i32
  }
  func.func @transform_2(%arg0: i32) -> (i32, i32) {
    %c0_i32 = arith.constant 0 : i32
    %c0_i32_0 = arith.constant 0 : i32
    %c0_i32_1 = arith.constant 0 : i32
    return %c0_i32, %c0_i32_0 : i32, i32
  }
  func.func @transform_3(%arg0: i32) -> (i32, i32) {
    %c0_i32 = arith.constant 0 : i32
    %c0_i32_0 = arith.constant 0 : i32
    %c0_i32_1 = arith.constant 0 : i32
    return %c0_i32, %c0_i32_0 : i32, i32
  }
  func.func @transform_4(%arg0: i32) -> (i32, i32) {
    %c0_i32 = arith.constant 0 : i32
    %c0_i32_0 = arith.constant 0 : i32
    %c0_i32_1 = arith.constant 0 : i32
    return %c0_i32, %c0_i32_0 : i32, i32
  }
  func.func @transform_5(%arg0: i32) -> (i32, i32) {
    %c0_i32 = arith.constant 0 : i32
    %c0_i32_0 = arith.constant 0 : i32
    %c0_i32_1 = arith.constant 0 : i32
    return %c0_i32, %c0_i32_0 : i32, i32
  }
  func.func @transform_6(%arg0: i32) -> (i32, i32) {
    %c0_i32 = arith.constant 0 : i32
    %c0_i32_0 = arith.constant 0 : i32
    %c0_i32_1 = arith.constant 0 : i32
    return %c0_i32, %c0_i32_0 : i32, i32
  }
  func.func @transform_7(%arg0: i32) -> (i32, i32) {
    %c0_i32 = arith.constant 0 : i32
    %c0_i32_0 = arith.constant 0 : i32
    %c0_i32_1 = arith.constant 0 : i32
    return %c0_i32, %c0_i32_0 : i32, i32
  }
  func.func @transform_8(%arg0: i32) -> (i32, i32) {
    %c0_i32 = arith.constant 0 : i32
    %c0_i32_0 = arith.constant 0 : i32
    %c0_i32_1 = arith.constant 0 : i32
    return %c0_i32, %c0_i32_0 : i32, i32
  }
  func.func @transform_9(%arg0: i32) -> (i32, i32) {
    %c0_i32 = arith.constant 0 : i32
    %c0_i32_0 = arith.constant 0 : i32
    %c0_i32_1 = arith.constant 0 : i32
    return %c0_i32, %c0_i32_0 : i32, i32
  }
  func.func @transform_10(%arg0: i32) -> (i32, i32) {
    %c0_i32 = arith.constant 0 : i32
    %c0_i32_0 = arith.constant 0 : i32
    %c0_i32_1 = arith.constant 0 : i32
    return %c0_i32, %c0_i32_0 : i32, i32
  }
  func.func @transform_11(%arg0: i32) -> (i32, i32) {
    %c0_i32 = arith.constant 0 : i32
    %c0_i32_0 = arith.constant 0 : i32
    %c0_i32_1 = arith.constant 0 : i32
    return %c0_i32, %c0_i32_0 : i32, i32
  }
  func.func @transform_12(%arg0: i32) -> (i32, i32) {
    %c0_i32 = arith.constant 0 : i32
    %c0_i32_0 = arith.constant 0 : i32
    %c0_i32_1 = arith.constant 0 : i32
    return %c0_i32, %c0_i32_0 : i32, i32
  }
  func.func @transform_13(%arg0: i32) -> (i32, i32) {
    %c0_i32 = arith.constant 0 : i32
    %c0_i32_0 = arith.constant 0 : i32
    %c0_i32_1 = arith.constant 0 : i32
    return %c0_i32, %c0_i32_0 : i32, i32
  }
  func.func @transform_14(%arg0: i32) -> (i32, i32, i32) {
    %c0_i32 = arith.constant 0 : i32
    %c0_i32_0 = arith.constant 0 : i32
    %c0_i32_1 = arith.constant 0 : i32
    return %arg0, %c0_i32, %c0_i32_0 : i32, i32, i32
  }
  func.func @transform_15(%arg0: i32) -> (i32, i32, i32) {
    %c0_i32 = arith.constant 0 : i32
    %c0_i32_0 = arith.constant 0 : i32
    %c0_i32_1 = arith.constant 0 : i32
    return %arg0, %c0_i32, %c0_i32_0 : i32, i32, i32
  }
}

</mosaic_0001>

<bundles_post_ra>
// kernel: _lambda_.1
= control target key start
LH: loop header
LB: loop body
LE: loop exit
PB: predicated region body
PF: predicated region fallthrough
CT: control target
= control target key end

     0   :  { %s2808_s18 = smov 0   ;;  %s3587_s0 = inlined_call_operand.vmem [shape: f32[2,4,1024], index: 0, kind: input, shape index: {}]   ;;  %s3588_s1 = inlined_call_operand.vmem [shape: f32[128,4], index: 1, kind: input, shape index: {}]   ;;  %s3589_s2 = inlined_call_operand.vmem [shape: f32[128,128], index: 2, kind: input, shape index: {}]   ;;  %s3590_s3 = inlined_call_operand.vmem [shape: f32[1,128], index: 3, kind: input, shape index: {}, may-alias: {3,6}]   ;;  %s3591_s4 = inlined_call_operand.vmem [shape: f32[1,128], index: 4, kind: input, shape index: {}, may-alias: {4,7,13}]   ;;  %s3592_s5 = inlined_call_operand.vmem [shape: f32[128,128], index: 5, kind: input, shape index: {}]   ;;  %s3593_s6 = inlined_call_operand.vmem [shape: f32[1,128], index: 6, kind: input, shape index: {}, may-alias: {3,6}]   ;;  %s3594_s7 = inlined_call_operand.vmem [shape: f32[1,128], index: 7, kind: input, shape index: {}, may-alias: {4,7,13}]   ;;  %s3595_s8 = inlined_call_operand.vmem [shape: f32[128,128], index: 8, kind: input, shape index: {}]   ;;  %s3596_s9 = inlined_call_operand.vmem [shape: f32[128,64], index: 9, kind: input, shape index: {}]   ;;  %s3597_s10 = inlined_call_operand.vmem [shape: f32[1,64], index: 10, kind: input, shape index: {}]   ;;  %s3598_s11 = inlined_call_operand.vmem [shape: f32[1,64], index: 11, kind: input, shape index: {}]   ;;  %s3599_s12 = inlined_call_operand.vmem [shape: f32[64,128], index: 12, kind: input, shape index: {}]   ;;  %s3600_s13 = inlined_call_operand.vmem [shape: f32[1,128], index: 13, kind: input, shape index: {}, may-alias: {4,7,13}]   ;;  %s3601_s14 = inlined_call_operand.vmem [shape: f32[2,4,128], index: 14, kind: output, shape index: {0}]   ;;  %s3602_s15 = inlined_call_operand.vmem [shape: f32[2,4,128], index: 15, kind: output, shape index: {1}]  }
   0x1 LB: > { %s2366_s19 = sadd.s32 4294967295, %s2724_s18   ;;  %p2370_p0 = scmp.ge.s32.totalorder %s2724_s18, 1  ;;  %s2724_s18 = sphi %s2808_s18, %s26_s18  }
   0x2   : > { %p440_p1 = scmp.lt.s32.totalorder %s2724_s18, 3 }
   0x4   : > { %p441_p2 = pnand %p2370_p0, %p440_p1 }
   0x5   : > { %p491_p3 = scmp.lt.s32.totalorder (!%p441_p2), %s2366_s19, 1 }
   0x6   : > { %444 = sbr.rel (%p441_p2) target bundleno = 1750 (0x6d6), region = 76 }
   0xb   : > { %v2726_v0 = vmov 0.0   ;;  %s3604_s19 = smov (!%p491_p3, %s2366_s19), 1  ;;  %vm581_vm0 = vcmask 1043456   ;;  %v2827_v6 = vld [vmem:[%s3588_s1] sm:$0xff]  ;;  %vm532_vm1 = vcmask 31744   ;;  %v2832_v7 = vld [vmem:[%s3588_s1 + $0x70] sm:$0xff] }
   0xc   : > { %662 = vmatprep.mubr.f32.mxu0 %v2726_v0  ;;  %746 = vmatprep.mubr.f32.mxu1 %v2726_v0  ;;  %s2457_s20 = sshll.u32 %s3604_s19, 5  ;;  %v2847_v11 = vld [vmem:[%s3588_s1 + $0x8] sm:$0xff]  ;;  %v2852_v12 = vld [vmem:[%s3588_s1 + $0x78] sm:$0xff]  ;;  %v2867_v13 = vld [vmem:[%s3588_s1 + $0x10] sm:$0xff]  ;;  %vm2727_vm2 = vmmov 0   ;;  %vm1627_vm3 = vcmask 7168  }
   0xd   : > { %s495_s23 = scalar_lea.vmem %s3587_s0, %s2457_s20  ;;  %v2880_v14 = vld [vmem:[%s3588_s1 + $0x18] sm:$0xff]  ;;  %v2893_v15 = vld [vmem:[%s3588_s1 + $0x20] sm:$0xff]  ;;  %v2904_v16 = vld [vmem:[%s3588_s1 + $0x28] sm:$0xff]  ;;  %vm1644_vm4 = vcmask 15360   ;;  %vm1661_vm5 = vcmask 23552   ;;  %vm2155_vm6 = vcmask 519168  }
   0xe   : > { %v520_v1 = vld [vmem:[%s495_s23] sm:$0xff]  ;;  %v521_v2 = vld [vmem:[%s495_s23 + $0x8] sm:$0xff]  ;;  %v522_v4 = vld [vmem:[%s495_s23 + $0x10] sm:$0xff]  ;;  %vm2207_vm7 = vcmask 523264  }
   0xf   : > { %v528_v3 = vcombine.high %v520_v1, %v520_v1  ;;  %v523_v5 = vld [vmem:[%s495_s23 + $0x18] sm:$0xff]  ;;  %v529_v8 = vcombine.high %v521_v2, %v521_v2  ;;  %v530_v9 = vcombine.high %v522_v4, %v522_v4  ;;  %v2915_v17 = vld [vmem:[%s3588_s1 + $0x30] sm:$0xff]  ;;  %v2937_v19 = vld [vmem:[%s3588_s1 + $0x40] sm:$0xff]  ;;  %s2373_s23 = sshll.u32 %s3604_s19, 2 }
  0x10   : > { %v531_v10 = vcombine.high %v523_v5, %v523_v5  ;;  %v2926_v18 = vld [vmem:[%s3588_s1 + $0x38] sm:$0xff]  ;;  %v2948_v20 = vld [vmem:[%s3588_s1 + $0x48] sm:$0xff]  ;;  %v2959_v21 = vld [vmem:[%s3588_s1 + $0x50] sm:$0xff]  ;;  %s499_s26 = scalar_lea.vmem %s3601_s14, %s2373_s23  ;;  %s503_s27 = scalar_lea.vmem %s3602_s15, %s2373_s23 }
  0x11   : > { %2375 = vmatprep.subr.msk.mxu0 %vm581_vm0, %v528_v3  ;;  %2694 = vmatprep.subr.msk.mxu1 %vm581_vm0, %v528_v3  ;;  %v2970_v22 = vld [vmem:[%s3588_s1 + $0x58] sm:$0xff]  ;;  %v2981_v23 = vld [vmem:[%s3588_s1 + $0x60] sm:$0xff]  ;;  %v2992_v24 = vld [vmem:[%s3588_s1 + $0x68] sm:$0xff] }
  0x12   : > { %2376 = vmatpush1.msk.msra.mxu0 %vm581_vm0, %v520_v1  ;;  %2695 = vmatpush1.msk.msra.mxu1 %vm581_vm0, %v520_v1 }
  0x13   : > { %2377 = vmatmul.mubr.msk.f32.vlgmr.msra.gmra.mxu0 %vm532_vm1, %v2827_v6  ;;  %2391 = vmatmul.mubr.msk.f32.vlgmr.msra.gmra.mxu1 %vm532_vm1, %v2832_v7 }
  0x14   : > { %2393 = vmatprep.subr.msk.mxu1 %vm581_vm0, %v529_v8  ;;  %668 = vmatprep.mubr.f32.mxu0 %v2726_v0 }
  0x15   : > { %2394 = vmatpush1.msk.msra.mxu1 %vm581_vm0, %v521_v2  ;;  %752 = vmatprep.mubr.f32.mxu1 %v2726_v0 }
  0x16   : > { %2411 = vmatprep.subr.msk.mxu0 %vm581_vm0, %v530_v9  ;;  %2429 = vmatprep.subr.msk.mxu1 %vm581_vm0, %v531_v10 }
  0x17   : > { %2378 = vmatmul.mubr.msk.f32.gmra.mxu0 %vm532_vm1, %v2847_v11  ;;  %2392 = vmatmul.mubr.msk.f32.gmra.mxu1 %vm532_vm1, %v2852_v12 }
  0x18   : > { %2412 = vmatpush1.msk.msra.mxu0 %vm581_vm0, %v522_v4  ;;  %674 = vmatprep.mubr.f32.mxu0 %v2726_v0 }
  0x19   : > { %823 = vmatprep.mubr.f32.mxu1 %v2726_v0  ;;  %2535 = vmatprep.subr.mxu0 %v2726_v0 }
  0x1b   : > { %2379 = vmatmul.mubr.msk.f32.gmra.mxu0 %vm532_vm1, %v2867_v13  ;;  %2395 = vmatmul.mubr.msk.f32.vlgmr.msra.gmra.mxu1 %vm532_vm1, %v2827_v6 }
  0x1c   : > { %2430 = vmatpush1.msk.msra.mxu1 %vm581_vm0, %v523_v5  ;;  %680 = vmatprep.mubr.f32.mxu0 %v2726_v0 }
  0x1d   : > { %829 = vmatprep.mubr.f32.mxu1 %v2726_v0  ;;  %2570 = vmatprep.subr.mxu1 %v2726_v0 }
  0x1f   : > { %2380 = vmatmul.mubr.msk.f32.gmra.mxu0 %vm532_vm1, %v2880_v14  ;;  %2396 = vmatmul.mubr.msk.f32.gmra.mxu1 %vm532_vm1, %v2847_v11 }
  0x20   : > { %686 = vmatprep.mubr.f32.mxu0 %v2726_v0  ;;  %835 = vmatprep.mubr.f32.mxu1 %v2726_v0 }
  0x23   : > { %2381 = vmatmul.mubr.msk.f32.gmra.mxu0 %vm532_vm1, %v2893_v15  ;;  %2397 = vmatmul.mubr.msk.f32.gmra.mxu1 %vm532_vm1, %v2867_v13 }
  0x24   : > { %692 = vmatprep.mubr.f32.mxu0 %v2726_v0  ;;  %841 = vmatprep.mubr.f32.mxu1 %v2726_v0 }
  0x27   : > { %2382 = vmatmul.mubr.msk.f32.gmra.mxu0 %vm532_vm1, %v2904_v16  ;;  %2398 = vmatmul.mubr.msk.f32.gmra.mxu1 %vm532_vm1, %v2880_v14 }
  0x28   : > { %698 = vmatprep.mubr.f32.mxu0 %v2726_v0  ;;  %847 = vmatprep.mubr.f32.mxu1 %v2726_v0 }
  0x2b   : > { %2383 = vmatmul.mubr.msk.f32.gmra.mxu0 %vm532_vm1, %v2915_v17  ;;  %2399 = vmatmul.mubr.msk.f32.gmra.mxu1 %vm532_vm1, %v2893_v15 }
  0x2c   : > { %704 = vmatprep.mubr.f32.mxu0 %v2726_v0  ;;  %853 = vmatprep.mubr.f32.mxu1 %v2726_v0 }
  0x2f   : > { %2384 = vmatmul.mubr.msk.f32.gmra.mxu0 %vm532_vm1, %v2926_v18  ;;  %2400 = vmatmul.mubr.msk.f32.gmra.mxu1 %vm532_vm1, %v2904_v16 }
  0x30   : > { %710 = vmatprep.mubr.f32.mxu0 %v2726_v0  ;;  %859 = vmatprep.mubr.f32.mxu1 %v2726_v0 }
  0x33   : > { %2385 = vmatmul.mubr.msk.f32.gmra.mxu0 %vm532_vm1, %v2937_v19  ;;  %2401 = vmatmul.mubr.msk.f32.gmra.mxu1 %vm532_vm1, %v2915_v17 }
  0x34   : > { %716 = vmatprep.mubr.f32.mxu0 %v2726_v0  ;;  %865 = vmatprep.mubr.f32.mxu1 %v2726_v0 }
  0x37   : > { %2386 = vmatmul.mubr.msk.f32.gmra.mxu0 %vm532_vm1, %v2948_v20  ;;  %2402 = vmatmul.mubr.msk.f32.gmra.mxu1 %vm532_vm1, %v2926_v18 }
  0x38   : > { %722 = vmatprep.mubr.f32.mxu0 %v2726_v0  ;;  %871 = vmatprep.mubr.f32.mxu1 %v2726_v0 }
  0x3b   : > { %2387 = vmatmul.mubr.msk.f32.gmra.mxu0 %vm532_vm1, %v2959_v21  ;;  %2403 = vmatmul.mubr.msk.f32.gmra.mxu1 %vm532_vm1, %v2937_v19 }
  0x3c   : > { %728 = vmatprep.mubr.f32.mxu0 %v2726_v0  ;;  %877 = vmatprep.mubr.f32.mxu1 %v2726_v0 }
  0x3f   : > { %2388 = vmatmul.mubr.msk.f32.gmra.mxu0 %vm532_vm1, %v2970_v22  ;;  %2404 = vmatmul.mubr.msk.f32.gmra.mxu1 %vm532_vm1, %v2948_v20 }
  0x40   : > { %734 = vmatprep.mubr.f32.mxu0 %v2726_v0  ;;  %883 = vmatprep.mubr.f32.mxu1 %v2726_v0 }
  0x43   : > { %2389 = vmatmul.mubr.msk.f32.gmra.mxu0 %vm532_vm1, %v2981_v23  ;;  %2405 = vmatmul.mubr.msk.f32.gmra.mxu1 %vm532_vm1, %v2959_v21 }
  0x44   : > { %740 = vmatprep.mubr.f32.mxu0 %v2726_v0  ;;  %889 = vmatprep.mubr.f32.mxu1 %v2726_v0 }
  0x47   : > { %2390 = vmatmul.mubr.msk.f32.gmra.mxu0 %vm532_vm1, %v2992_v24  ;;  %2406 = vmatmul.mubr.msk.f32.gmra.mxu1 %vm532_vm1, %v2970_v22 }
  0x48   : > { %895 = vmatprep.mubr.f32.mxu1 %v2726_v0  ;;  %984 = vmatprep.mubr.f32.mxu0 %v2726_v0 }
  0x4b   : > { %2407 = vmatmul.mubr.msk.f32.gmra.mxu1 %vm532_vm1, %v2981_v23  ;;  %2413 = vmatmul.mubr.msk.f32.vlgmr.msra.gmra.mxu0 %vm532_vm1, %v2827_v6 }
  0x4c   : > { %901 = vmatprep.mubr.f32.mxu1 %v2726_v0  ;;  %990 = vmatprep.mubr.f32.mxu0 %v2726_v0 }
  0x4f   : > { %2408 = vmatmul.mubr.msk.f32.gmra.mxu1 %vm532_vm1, %v2992_v24  ;;  %2414 = vmatmul.mubr.msk.f32.gmra.mxu0 %vm532_vm1, %v2847_v11 }
  0x50   : > { %907 = vmatprep.mubr.f32.mxu1 %v2726_v0  ;;  %996 = vmatprep.mubr.f32.mxu0 %v2726_v0 }
  0x53   : > { %2409 = vmatmul.mubr.msk.f32.gmra.mxu1 %vm532_vm1, %v2832_v7  ;;  %2415 = vmatmul.mubr.msk.f32.gmra.mxu0 %vm532_vm1, %v2867_v13 }
  0x54   : > { %913 = vmatprep.mubr.f32.mxu1 %v2726_v0  ;;  %1002 = vmatprep.mubr.f32.mxu0 %v2726_v0 }
  0x57   : > { %2410 = vmatmul.mubr.msk.f32.gmra.mxu1 %vm532_vm1, %v2852_v12  ;;  %2416 = vmatmul.mubr.msk.f32.gmra.mxu0 %vm532_vm1, %v2880_v14 }
  0x58   : > { %1145 = vmatprep.mubr.f32.mxu1 %v2726_v0  ;;  %1008 = vmatprep.mubr.f32.mxu0 %v2726_v0 }
  0x5b   : > { %2431 = vmatmul.mubr.msk.f32.vlgmr.msra.gmra.mxu1 %vm532_vm1, %v2827_v6  ;;  %2417 = vmatmul.mubr.msk.f32.gmra.mxu0 %vm532_vm1, %v2893_v15 }
  0x5c   : > { %1151 = vmatprep.mubr.f32.mxu1 %v2726_v0  ;;  %1014 = vmatprep.mubr.f32.mxu0 %v2726_v0 }
  0x5f   : > { %2432 = vmatmul.mubr.msk.f32.gmra.mxu1 %vm532_vm1, %v2847_v11  ;;  %2418 = vmatmul.mubr.msk.f32.gmra.mxu0 %vm532_vm1, %v2904_v16 }
  0x60   : > { %1157 = vmatprep.mubr.f32.mxu1 %v2726_v0  ;;  %1020 = vmatprep.mubr.f32.mxu0 %v2726_v0 }
  0x63   : > { %2433 = vmatmul.mubr.msk.f32.gmra.mxu1 %vm532_vm1, %v2867_v13  ;;  %2419 = vmatmul.mubr.msk.f32.gmra.mxu0 %vm532_vm1, %v2915_v17 }
  0x64   : > { %1163 = vmatprep.mubr.f32.mxu1 %v2726_v0  ;;  %1026 = vmatprep.mubr.f32.mxu0 %v2726_v0 }
  0x67   : > { %2434 = vmatmul.mubr.msk.f32.gmra.mxu1 %vm532_vm1, %v2880_v14  ;;  %2420 = vmatmul.mubr.msk.f32.gmra.mxu0 %vm532_vm1, %v2926_v18 }
  0x68   : > { %1169 = vmatprep.mubr.f32.mxu1 %v2726_v0  ;;  %1032 = vmatprep.mubr.f32.mxu0 %v2726_v0 }
  0x6b   : > { %2435 = vmatmul.mubr.msk.f32.gmra.mxu1 %vm532_vm1, %v2893_v15  ;;  %2421 = vmatmul.mubr.msk.f32.gmra.mxu0 %vm532_vm1, %v2937_v19 }
  0x6c   : > { %1175 = vmatprep.mubr.f32.mxu1 %v2726_v0  ;;  %1038 = vmatprep.mubr.f32.mxu0 %v2726_v0 }
  0x6f   : > { %2436 = vmatmul.mubr.msk.f32.gmra.mxu1 %vm532_vm1, %v2904_v16  ;;  %2422 = vmatmul.mubr.msk.f32.gmra.mxu0 %vm532_vm1, %v2948_v20 }
  0x70   : > { %1181 = vmatprep.mubr.f32.mxu1 %v2726_v0  ;;  %1044 = vmatprep.mubr.f32.mxu0 %v2726_v0 }
  0x73   : > { %2437 = vmatmul.mubr.msk.f32.gmra.mxu1 %vm532_vm1, %v2915_v17  ;;  %2423 = vmatmul.mubr.msk.f32.gmra.mxu0 %vm532_vm1, %v2959_v21 }
  0x74   : > { %1187 = vmatprep.mubr.f32.mxu1 %v2726_v0  ;;  %1050 = vmatprep.mubr.f32.mxu0 %v2726_v0 }
  0x77   : > { %2438 = vmatmul.mubr.msk.f32.gmra.mxu1 %vm532_vm1, %v2926_v18  ;;  %2424 = vmatmul.mubr.msk.f32.gmra.mxu0 %vm532_vm1, %v2970_v22 }
  0x78   : > { %1193 = vmatprep.mubr.f32.mxu1 %v2726_v0  ;;  %1056 = vmatprep.mubr.f32.mxu0 %v2726_v0 }
  0x7b   : > { %2439 = vmatmul.mubr.msk.f32.gmra.mxu1 %vm532_vm1, %v2937_v19  ;;  %2425 = vmatmul.mubr.msk.f32.gmra.mxu0 %vm532_vm1, %v2981_v23 }
  0x7c   : > { %1199 = vmatprep.mubr.f32.mxu1 %v2726_v0  ;;  %1062 = vmatprep.mubr.f32.mxu0 %v2726_v0 }
  0x7f   : > { %2440 = vmatmul.mubr.msk.f32.gmra.mxu1 %vm532_vm1, %v2948_v20  ;;  %2426 = vmatmul.mubr.msk.f32.gmra.mxu0 %vm532_vm1, %v2992_v24 }
  0x80   : > { %1205 = vmatprep.mubr.f32.mxu1 %v2726_v0  ;;  %1068 = vmatprep.mubr.f32.mxu0 %v2726_v0 }
  0x83   : > { %2441 = vmatmul.mubr.msk.f32.gmra.mxu1 %vm532_vm1, %v2959_v21  ;;  %2427 = vmatmul.mubr.msk.f32.gmra.mxu0 %vm532_vm1, %v2832_v7 }
  0x84   : > { %1211 = vmatprep.mubr.f32.mxu1 %v2726_v0  ;;  %1074 = vmatprep.mubr.f32.mxu0 %v2726_v0 }
  0x87   : > { %2442 = vmatmul.mubr.msk.f32.gmra.mxu1 %vm532_vm1, %v2970_v22  ;;  %2428 = vmatmul.mubr.msk.f32.gmra.mxu0 %vm532_vm1, %v2852_v12 }
  0x88   : > { %1217 = vmatprep.mubr.f32.mxu1 %v2726_v0  ;;  %2567 = vmatprep.mubr.msk.f32.mxu0 %vm2727_vm2, %v2726_v0 }
  0x8b   : > { %2443 = vmatmul.mubr.msk.f32.gmra.mxu1 %vm532_vm1, %v2981_v23 }
  0x8c   : > { %1223 = vmatprep.mubr.f32.mxu1 %v2726_v0 }
  0x8f   : > { %2444 = vmatmul.mubr.msk.f32.gmra.mxu1 %vm532_vm1, %v2992_v24 }
  0x90   : > { %1229 = vmatprep.mubr.f32.mxu1 %v2726_v0 }
  0x93   : > { %2445 = vmatmul.mubr.msk.f32.gmra.mxu1 %vm532_vm1, %v2832_v7 }
  0x94   : > { %1235 = vmatprep.mubr.f32.mxu1 %v2726_v0 }
  0x97   : > { %2446 = vmatmul.mubr.msk.f32.gmra.mxu1 %vm532_vm1, %v2852_v12 }
  0x98   : > { %2602 = vmatprep.mubr.msk.f32.mxu1 %vm2727_vm2, %v2726_v0 }
  0xd3   : > { %v664_v25 = vpop.f32.mrf.mxu0  ;;  %v748_v26 = vpop.f32.mrf.mxu1 }
  0xd4   : > { %v1242_v27 = vmax.f32 %v664_v25, 0.0  ;;  %v1354_v30 = vmax.f32 %v748_v26, 0.0 }
  0xd5   : > { %v666_v28 = vpop.f32.mrf.mxu0  ;;  %v750_v29 = vpop.f32.mrf.mxu1 }
  0xd6   : > { %v1243_v31 = vmax.f32 %v666_v28, 0.0  ;;  %v1355_v32 = vmax.f32 %v750_v29, 0.0 }
  0xd7   : > { %v670_v33 = vpop.f32.mrf.mxu0  ;;  %v754_v34 = vpop.f32.mrf.mxu1 }
  0xd8   : > { %v1250_v35 = vmax.f32 %v670_v33, 0.0  ;;  %v1412_v36 = vadd.f32 %v1355_v32, %v1354_v30  ;;  %v1370_v37 = vadd.f32 %v1243_v31, %v1242_v27  ;;  %v1362_v47 = vmax.f32 %v754_v34, 0.0 }
  0xd9   : > { %v672_v38 = vpop.f32.mrf.mxu0  ;;  %v756_v39 = vpop.f32.mrf.mxu1 }
  0xda   : > { %v1251_v40 = vmax.f32 %v672_v38, 0.0  ;;  %1413 = vadd.xlane.f32.xlu1 %v1412_v36  ;;  %1371 = vadd.xlane.f32.xlu0 %v1370_v37  ;;  %v1363_v43 = vmax.f32 %v756_v39, 0.0 }
  0xdb   : > { %v676_v41 = vpop.f32.mrf.mxu0  ;;  %v825_v42 = vpop.f32.mrf.mxu1 }
  0xdc   : > { %v1373_v44 = vadd.f32 %v1251_v40, %v1250_v35  ;;  %v1244_v48 = vmax.f32 %v825_v42, 0.0  ;;  %v1258_v52 = vmax.f32 %v676_v41, 0.0  ;;  %v1415_v55 = vadd.f32 %v1363_v43, %v1362_v47 }
  0xdd   : > { %v678_v45 = vpop.f32.mrf.mxu0  ;;  %v827_v46 = vpop.f32.mrf.mxu1 }
  0xde   : > { %v1245_v49 = vmax.f32 %v827_v46, 0.0  ;;  %1374 = vadd.xlane.f32.xlu1 %v1373_v44  ;;  %v1259_v53 = vmax.f32 %v678_v45, 0.0 }
  0xdf   : > { %v682_v50 = vpop.f32.mrf.mxu0  ;;  %v831_v51 = vpop.f32.mrf.mxu1 }
  0xe0   : > { %v1435_v54 = vadd.f32 %v1245_v49, %v1244_v48  ;;  %v1252_v58 = vmax.f32 %v831_v51, 0.0  ;;  %v1266_v62 = vmax.f32 %v682_v50, 0.0  ;;  %v1376_v2 = vadd.f32 %v1259_v53, %v1258_v52 }
  0xe1   : > { %v684_v56 = vpop.f32.mrf.mxu0  ;;  %v833_v57 = vpop.f32.mrf.mxu1 }
  0xe2   : > { %v1253_v59 = vmax.f32 %v833_v57, 0.0  ;;  %1436 = vadd.xlane.f32.xlu0 %v1435_v54  ;;  %1416 = vadd.xlane.f32.xlu1 %v1415_v55  ;;  %v1267_v63 = vmax.f32 %v684_v56, 0.0 }
  0xe3   : > { %v688_v60 = vpop.f32.mrf.mxu0  ;;  %v837_v61 = vpop.f32.mrf.mxu1 }
  0xe4   : > { %v1438_v1 = vadd.f32 %v1253_v59, %v1252_v58  ;;  %v1260_v5 = vmax.f32 %v837_v61, 0.0  ;;  %v1274_v9 = vmax.f32 %v688_v60, 0.0  ;;  %v1379_v12 = vadd.f32 %v1267_v63, %v1266_v62 }
  0xe5   : > { %v690_v3 = vpop.f32.mrf.mxu0  ;;  %v839_v4 = vpop.f32.mrf.mxu1 }
  0xe6   : > { %v1261_v6 = vmax.f32 %v839_v4, 0.0  ;;  %1439 = vadd.xlane.f32.xlu0 %v1438_v1  ;;  %1377 = vadd.xlane.f32.xlu1 %v1376_v2  ;;  %v1275_v10 = vmax.f32 %v690_v3, 0.0 }
  0xe7   : > { %v694_v7 = vpop.f32.mrf.mxu0  ;;  %v843_v8 = vpop.f32.mrf.mxu1 }
  0xe8   : > { %v1441_v11 = vadd.f32 %v1261_v6, %v1260_v5  ;;  %v1268_v15 = vmax.f32 %v843_v8, 0.0  ;;  %v1282_v19 = vmax.f32 %v694_v7, 0.0  ;;  %v1382_v22 = vadd.f32 %v1275_v10, %v1274_v9 }
  0xe9   : > { %v696_v13 = vpop.f32.mrf.mxu0  ;;  %v845_v14 = vpop.f32.mrf.mxu1 }
  0xea   : > { %v1269_v16 = vmax.f32 %v845_v14, 0.0  ;;  %1442 = vadd.xlane.f32.xlu0 %v1441_v11  ;;  %1380 = vadd.xlane.f32.xlu1 %v1379_v12  ;;  %v1283_v20 = vmax.f32 %v696_v13, 0.0 }
  0xeb   : > { %v700_v17 = vpop.f32.mrf.mxu0  ;;  %v849_v18 = vpop.f32.mrf.mxu1 }
  0xec   : > { %v1444_v21 = vadd.f32 %v1269_v16, %v1268_v15  ;;  %v1276_v25 = vmax.f32 %v849_v18, 0.0  ;;  %v1290_v29 = vmax.f32 %v700_v17, 0.0  ;;  %v1385_v32 = vadd.f32 %v1283_v20, %v1282_v19 }
  0xed   : > { %v702_v23 = vpop.f32.mrf.mxu0  ;;  %v851_v24 = vpop.f32.mrf.mxu1 }
  0xee   : > { %v1277_v26 = vmax.f32 %v851_v24, 0.0  ;;  %1445 = vadd.xlane.f32.xlu0 %v1444_v21  ;;  %1383 = vadd.xlane.f32.xlu1 %v1382_v22  ;;  %v1291_v30 = vmax.f32 %v702_v23, 0.0 }
  0xef   : > { %v706_v27 = vpop.f32.mrf.mxu0  ;;  %v855_v28 = vpop.f32.mrf.mxu1 }
  0xf0   : > { %v1447_v31 = vadd.f32 %v1277_v26, %v1276_v25  ;;  %v1284_v35 = vmax.f32 %v855_v28, 0.0  ;;  %v1298_v39 = vmax.f32 %v706_v27, 0.0  ;;  %v1388_v42 = vadd.f32 %v1291_v30, %v1290_v29 }
  0xf1   : > { %v708_v33 = vpop.f32.mrf.mxu0  ;;  %v857_v34 = vpop.f32.mrf.mxu1 }
  0xf2   : > { %v1285_v36 = vmax.f32 %v857_v34, 0.0  ;;  %1448 = vadd.xlane.f32.xlu0 %v1447_v31  ;;  %1386 = vadd.xlane.f32.xlu1 %v1385_v32  ;;  %v1299_v40 = vmax.f32 %v708_v33, 0.0 }
  0xf3   : > { %v712_v37 = vpop.f32.mrf.mxu0  ;;  %v861_v38 = vpop.f32.mrf.mxu1 }
  0xf4   : > { %v1450_v41 = vadd.f32 %v1285_v36, %v1284_v35  ;;  %v1292_v45 = vmax.f32 %v861_v38, 0.0  ;;  %v1306_v49 = vmax.f32 %v712_v37, 0.0  ;;  %v1391_v52 = vadd.f32 %v1299_v40, %v1298_v39 }
  0xf5   : > { %v714_v43 = vpop.f32.mrf.mxu0  ;;  %v863_v44 = vpop.f32.mrf.mxu1 }
  0xf6   : > { %v1293_v46 = vmax.f32 %v863_v44, 0.0  ;;  %1451 = vadd.xlane.f32.xlu0 %v1450_v41  ;;  %1389 = vadd.xlane.f32.xlu1 %v1388_v42  ;;  %v1307_v50 = vmax.f32 %v714_v43, 0.0 }
  0xf7   : > { %v718_v47 = vpop.f32.mrf.mxu0  ;;  %v867_v48 = vpop.f32.mrf.mxu1 }
  0xf8   : > { %v1453_v51 = vadd.f32 %v1293_v46, %v1292_v45  ;;  %v1300_v55 = vmax.f32 %v867_v48, 0.0  ;;  %v1314_v59 = vmax.f32 %v718_v47, 0.0  ;;  %v1394_v62 = vadd.f32 %v1307_v50, %v1306_v49 }
  0xf9   : > { %v720_v53 = vpop.f32.mrf.mxu0  ;;  %v869_v54 = vpop.f32.mrf.mxu1 }
  0xfa   : > { %v1301_v56 = vmax.f32 %v869_v54, 0.0  ;;  %1454 = vadd.xlane.f32.xlu0 %v1453_v51  ;;  %1392 = vadd.xlane.f32.xlu1 %v1391_v52  ;;  %v1315_v60 = vmax.f32 %v720_v53, 0.0 }
  0xfb   : > { %v724_v57 = vpop.f32.mrf.mxu0  ;;  %v873_v58 = vpop.f32.mrf.mxu1 }
  0xfc   : > { %v1456_v61 = vadd.f32 %v1301_v56, %v1300_v55  ;;  %v1308_v2 = vmax.f32 %v873_v58, 0.0  ;;  %v1322_v6 = vmax.f32 %v724_v57, 0.0  ;;  %v1397_v9 = vadd.f32 %v1315_v60, %v1314_v59 }
  0xfd   : > { %v726_v63 = vpop.f32.mrf.mxu0  ;;  %v875_v1 = vpop.f32.mrf.mxu1 }
  0xfe   : > { %v1309_v3 = vmax.f32 %v875_v1, 0.0  ;;  %1457 = vadd.xlane.f32.xlu0 %v1456_v61  ;;  %1395 = vadd.xlane.f32.xlu1 %v1394_v62  ;;  %v1323_v7 = vmax.f32 %v726_v63, 0.0 }
  0xff   : > { %v730_v4 = vpop.f32.mrf.mxu0  ;;  %v879_v5 = vpop.f32.mrf.mxu1 }
 0x100   : > { %v1459_v8 = vadd.f32 %v1309_v3, %v1308_v2  ;;  %v1316_v12 = vmax.f32 %v879_v5, 0.0  ;;  %v1330_v16 = vmax.f32 %v730_v4, 0.0  ;;  %v1400_v19 = vadd.f32 %v1323_v7, %v1322_v6 }
 0x101   : > { %v732_v10 = vpop.f32.mrf.mxu0  ;;  %v881_v11 = vpop.f32.mrf.mxu1 }
 0x102   : > { %v1317_v13 = vmax.f32 %v881_v11, 0.0  ;;  %1460 = vadd.xlane.f32.xlu0 %v1459_v8  ;;  %1398 = vadd.xlane.f32.xlu1 %v1397_v9  ;;  %v1331_v17 = vmax.f32 %v732_v10, 0.0 }
 0x103   : > { %v736_v14 = vpop.f32.mrf.mxu0  ;;  %v885_v15 = vpop.f32.mrf.mxu1 }
 0x104   : > { %v1462_v18 = vadd.f32 %v1317_v13, %v1316_v12  ;;  %v1324_v22 = vmax.f32 %v885_v15, 0.0  ;;  %v1338_v26 = vmax.f32 %v736_v14, 0.0  ;;  %v1403_v29 = vadd.f32 %v1331_v17, %v1330_v16 }
 0x105   : > { %v738_v20 = vpop.f32.mrf.mxu0  ;;  %v887_v21 = vpop.f32.mrf.mxu1 }
 0x106   : > { %v1325_v23 = vmax.f32 %v887_v21, 0.0  ;;  %1463 = vadd.xlane.f32.xlu0 %v1462_v18  ;;  %1401 = vadd.xlane.f32.xlu1 %v1400_v19  ;;  %v1339_v27 = vmax.f32 %v738_v20, 0.0 }
 0x107   : > { %v742_v24 = vpop.f32.mrf.mxu0  ;;  %v891_v25 = vpop.f32.mrf.mxu1 }
 0x108   : > { %v1465_v28 = vadd.f32 %v1325_v23, %v1324_v22  ;;  %v1332_v32 = vmax.f32 %v891_v25, 0.0  ;;  %v1346_v36 = vmax.f32 %v742_v24, 0.0  ;;  %v1406_v39 = vadd.f32 %v1339_v27, %v1338_v26 }
 0x109   : > { %v744_v30 = vpop.f32.mrf.mxu0  ;;  %v893_v31 = vpop.f32.mrf.mxu1 }
 0x10a   : > { %v1333_v33 = vmax.f32 %v893_v31, 0.0  ;;  %1466 = vadd.xlane.f32.xlu0 %v1465_v28  ;;  %1404 = vadd.xlane.f32.xlu1 %v1403_v29  ;;  %v1347_v37 = vmax.f32 %v744_v30, 0.0 }
 0x10b   : > { %v897_v34 = vpop.f32.mrf.mxu1  ;;  %v986_v35 = vpop.f32.mrf.mxu0 }
 0x10c   : > { %v1468_v38 = vadd.f32 %v1333_v33, %v1332_v32  ;;  %v1340_v42 = vmax.f32 %v897_v34, 0.0  ;;  %v1246_v44 = vmax.f32 %v986_v35, 0.0  ;;  %v1409_v50 = vadd.f32 %v1347_v37, %v1346_v36 }
 0x10d   : > { %v899_v40 = vpop.f32.mrf.mxu1  ;;  %v988_v41 = vpop.f32.mrf.mxu0 }
 0x10e   : > { %v1341_v43 = vmax.f32 %v899_v40, 0.0  ;;  %1469 = vadd.xlane.f32.xlu0 %v1468_v38  ;;  %1407 = vadd.xlane.f32.xlu1 %v1406_v39  ;;  %v1247_v47 = vmax.f32 %v988_v41, 0.0 }
 0x10f   : > { %v903_v45 = vpop.f32.mrf.mxu1  ;;  %v992_v46 = vpop.f32.mrf.mxu0 }
 0x110   : > { %v1254_v48 = vmax.f32 %v992_v46, 0.0  ;;  %v1471_v49 = vadd.f32 %v1341_v43, %v1340_v42  ;;  %v1499_v57 = vadd.f32 %v1247_v47, %v1246_v44  ;;  %v1348_v61 = vmax.f32 %v903_v45, 0.0 }
 0x111   : > { %v905_v51 = vpop.f32.mrf.mxu1  ;;  %v994_v52 = vpop.f32.mrf.mxu0 }
 0x112   : > { %v1255_v53 = vmax.f32 %v994_v52, 0.0  ;;  %1472 = vadd.xlane.f32.xlu0 %v1471_v49  ;;  %1410 = vadd.xlane.f32.xlu1 %v1409_v50  ;;  %v1349_v56 = vmax.f32 %v905_v51, 0.0 }
 0x113   : > { %v909_v54 = vpop.f32.mrf.mxu1  ;;  %v998_v55 = vpop.f32.mrf.mxu0 }
 0x114   : > { %v1502_v58 = vadd.f32 %v1255_v53, %v1254_v48  ;;  %v1262_v62 = vmax.f32 %v998_v55, 0.0  ;;  %v1474_v3 = vadd.f32 %v1349_v56, %v1348_v61  ;;  %v1356_v10 = vmax.f32 %v909_v54, 0.0 }
 0x115   : > { %v911_v59 = vpop.f32.mrf.mxu1  ;;  %v1000_v60 = vpop.f32.mrf.mxu0 }
 0x116   : > { %1500 = vadd.xlane.f32.xlu1 %v1499_v57  ;;  %1503 = vadd.xlane.f32.xlu0 %v1502_v58  ;;  %v1263_v63 = vmax.f32 %v1000_v60, 0.0  ;;  %v1357_v9 = vmax.f32 %v911_v59, 0.0 }
 0x117   : > { %v915_v1 = vpop.f32.mrf.mxu1  ;;  %v1004_v2 = vpop.f32.mrf.mxu0 }
 0x118   : > { %v1505_v6 = vadd.f32 %v1263_v63, %v1262_v62  ;;  %v1270_v15 = vmax.f32 %v1004_v2, 0.0  ;;  %v1477_v20 = vadd.f32 %v1357_v9, %v1356_v10  ;;  %v1364_v30 = vmax.f32 %v915_v1, 0.0 }
 0x119   : > { %v917_v4 = vpop.f32.mrf.mxu1  ;;  %v1006_v5 = vpop.f32.mrf.mxu0 }
 0x11a   : > { %1475 = vadd.xlane.f32.xlu0 %v1474_v3  ;;  %v1271_v16 = vmax.f32 %v1006_v5, 0.0  ;;  %v1365_v28 = vmax.f32 %v917_v4, 0.0 }
 0x11b   : > { %v1147_v7 = vpop.f32.mrf.mxu1  ;;  %v1010_v8 = vpop.f32.mrf.mxu0 }
 0x11c   : > { %v1248_v13 = vmax.f32 %v1147_v7, 0.0  ;;  %v1508_v25 = vadd.f32 %v1271_v16, %v1270_v15  ;;  %v1278_v35 = vmax.f32 %v1010_v8, 0.0  ;;  %v1480_v40 = vadd.f32 %v1365_v28, %v1364_v30 }
 0x11d   : > { %v1149_v11 = vpop.f32.mrf.mxu1  ;;  %v1012_v12 = vpop.f32.mrf.mxu0 }
 0x11e   : > { %v1249_v14 = vmax.f32 %v1149_v11, 0.0  ;;  %1506 = vadd.xlane.f32.xlu0 %v1505_v6  ;;  %v1279_v36 = vmax.f32 %v1012_v12, 0.0 }
 0x11f   : > { %v1153_v17 = vpop.f32.mrf.mxu1  ;;  %v1016_v18 = vpop.f32.mrf.mxu0 }
 0x120   : > { %v1563_v19 = vadd.f32 %v1249_v14, %v1248_v13  ;;  %v1256_v23 = vmax.f32 %v1153_v17, 0.0  ;;  %v1286_v42 = vmax.f32 %v1016_v18, 0.0  ;;  %v1511_v47 = vadd.f32 %v1279_v36, %v1278_v35 }
 0x121   : > { %v1155_v21 = vpop.f32.mrf.mxu1  ;;  %v1018_v22 = vpop.f32.mrf.mxu0 }
 0x122   : > { %v1257_v24 = vmax.f32 %v1155_v21, 0.0  ;;  %1564 = vadd.xlane.f32.xlu1 %v1563_v19  ;;  %1478 = vadd.xlane.f32.xlu0 %v1477_v20  ;;  %v1287_v46 = vmax.f32 %v1018_v22, 0.0 }
 0x123   : > { %v1159_v26 = vpop.f32.mrf.mxu1  ;;  %v1022_v27 = vpop.f32.mrf.mxu0 }
 0x124   : > { %v1566_v29 = vadd.f32 %v1257_v24, %v1256_v23  ;;  %v1264_v33 = vmax.f32 %v1159_v26, 0.0  ;;  %v1294_v52 = vmax.f32 %v1022_v27, 0.0  ;;  %v1514_v57 = vadd.f32 %v1287_v46, %v1286_v42 }
 0x125   : > { %v1161_v31 = vpop.f32.mrf.mxu1  ;;  %v1024_v32 = vpop.f32.mrf.mxu0 }
 0x126   : > { %v1265_v34 = vmax.f32 %v1161_v31, 0.0  ;;  %1567 = vadd.xlane.f32.xlu1 %v1566_v29  ;;  %1509 = vadd.xlane.f32.xlu0 %v1508_v25  ;;  %v1295_v56 = vmax.f32 %v1024_v32, 0.0 }
 0x127   : > { %v1165_v37 = vpop.f32.mrf.mxu1  ;;  %v1028_v38 = vpop.f32.mrf.mxu0 }
 0x128   : > { %v1569_v39 = vadd.f32 %v1265_v34, %v1264_v33  ;;  %v1272_v44 = vmax.f32 %v1165_v37, 0.0  ;;  %v1302_v62 = vmax.f32 %v1028_v38, 0.0  ;;  %v1517_v4 = vadd.f32 %v1295_v56, %v1294_v52 }
 0x129   : > { %v1167_v41 = vpop.f32.mrf.mxu1  ;;  %v1030_v43 = vpop.f32.mrf.mxu0 }
 0x12a   : > { %v1273_v45 = vmax.f32 %v1167_v41, 0.0  ;;  %1570 = vadd.xlane.f32.xlu1 %v1569_v39  ;;  %1481 = vadd.xlane.f32.xlu0 %v1480_v40  ;;  %v1303_v3 = vmax.f32 %v1030_v43, 0.0 }
 0x12b   : > { %v1171_v48 = vpop.f32.mrf.mxu1  ;;  %v1034_v49 = vpop.f32.mrf.mxu0 }
 0x12c   : > { %v1572_v50 = vadd.f32 %v1273_v45, %v1272_v44  ;;  %v1280_v54 = vmax.f32 %v1171_v48, 0.0  ;;  %v1310_v9 = vmax.f32 %v1034_v49, 0.0  ;;  %v1520_v14 = vadd.f32 %v1303_v3, %v1302_v62 }
 0x12d   : > { %v1173_v51 = vpop.f32.mrf.mxu1  ;;  %v1036_v53 = vpop.f32.mrf.mxu0 }
 0x12e   : > { %v1281_v55 = vmax.f32 %v1173_v51, 0.0  ;;  %1573 = vadd.xlane.f32.xlu1 %v1572_v50  ;;  %1512 = vadd.xlane.f32.xlu0 %v1511_v47  ;;  %v1311_v13 = vmax.f32 %v1036_v53, 0.0 }
 0x12f   : > { %v1177_v58 = vpop.f32.mrf.mxu1  ;;  %v1040_v59 = vpop.f32.mrf.mxu0 }
 0x130   : > { %v1575_v60 = vadd.f32 %v1281_v55, %v1280_v54  ;;  %v1288_v1 = vmax.f32 %v1177_v58, 0.0  ;;  %v1318_v19 = vmax.f32 %v1040_v59, 0.0  ;;  %v1523_v24 = vadd.f32 %v1311_v13, %v1310_v9 }
 0x131   : > { %v1179_v61 = vpop.f32.mrf.mxu1  ;;  %v1042_v63 = vpop.f32.mrf.mxu0 }
 0x132   : > { %v1289_v2 = vmax.f32 %v1179_v61, 0.0  ;;  %1576 = vadd.xlane.f32.xlu1 %v1575_v60  ;;  %1515 = vadd.xlane.f32.xlu0 %v1514_v57  ;;  %v1319_v23 = vmax.f32 %v1042_v63, 0.0 }
 0x133   : > { %v1183_v5 = vpop.f32.mrf.mxu1  ;;  %v1046_v6 = vpop.f32.mrf.mxu0 }
 0x134   : > { %v1578_v7 = vadd.f32 %v1289_v2, %v1288_v1  ;;  %v1296_v11 = vmax.f32 %v1183_v5, 0.0  ;;  %v1326_v29 = vmax.f32 %v1046_v6, 0.0  ;;  %v1526_v34 = vadd.f32 %v1319_v23, %v1318_v19 }
 0x135   : > { %v1185_v8 = vpop.f32.mrf.mxu1  ;;  %v1048_v10 = vpop.f32.mrf.mxu0 }
 0x136   : > { %v1297_v12 = vmax.f32 %v1185_v8, 0.0  ;;  %1579 = vadd.xlane.f32.xlu1 %v1578_v7  ;;  %1518 = vadd.xlane.f32.xlu0 %v1517_v4  ;;  %v1327_v33 = vmax.f32 %v1048_v10, 0.0 }
 0x137   : > { %v1189_v15 = vpop.f32.mrf.mxu1  ;;  %v1052_v16 = vpop.f32.mrf.mxu0 }
 0x138   : > { %v1581_v17 = vadd.f32 %v1297_v12, %v1296_v11  ;;  %v1304_v21 = vmax.f32 %v1189_v15, 0.0  ;;  %v1334_v39 = vmax.f32 %v1052_v16, 0.0  ;;  %v1529_v44 = vadd.f32 %v1327_v33, %v1326_v29 }
 0x139   : > { %v1191_v18 = vpop.f32.mrf.mxu1  ;;  %v1054_v20 = vpop.f32.mrf.mxu0 }
 0x13a   : > { %v1305_v22 = vmax.f32 %v1191_v18, 0.0  ;;  %1582 = vadd.xlane.f32.xlu1 %v1581_v17  ;;  %1521 = vadd.xlane.f32.xlu0 %v1520_v14  ;;  %v1335_v43 = vmax.f32 %v1054_v20, 0.0 }
 0x13b   : > { %v1195_v25 = vpop.f32.mrf.mxu1  ;;  %v1058_v26 = vpop.f32.mrf.mxu0 }
 0x13c   : > { %v1584_v27 = vadd.f32 %v1305_v22, %v1304_v21  ;;  %v1312_v31 = vmax.f32 %v1195_v25, 0.0  ;;  %v1342_v49 = vmax.f32 %v1058_v26, 0.0  ;;  %v1532_v53 = vadd.f32 %v1335_v43, %v1334_v39 }
 0x13d   : > { %v1197_v28 = vpop.f32.mrf.mxu1  ;;  %v1060_v30 = vpop.f32.mrf.mxu0 }
 0x13e   : > { %v1313_v32 = vmax.f32 %v1197_v28, 0.0  ;;  %1585 = vadd.xlane.f32.xlu1 %v1584_v27  ;;  %1524 = vadd.xlane.f32.xlu0 %v1523_v24  ;;  %v1343_v52 = vmax.f32 %v1060_v30, 0.0 }
 0x13f   : > { %v1201_v35 = vpop.f32.mrf.mxu1  ;;  %v1064_v36 = vpop.f32.mrf.mxu0 }
 0x140   : > { %v1587_v37 = vadd.f32 %v1313_v32, %v1312_v31  ;;  %v1320_v41 = vmax.f32 %v1201_v35, 0.0  ;;  %v1350_v58 = vmax.f32 %v1064_v36, 0.0  ;;  %v1535_v62 = vadd.f32 %v1343_v52, %v1342_v49  ;;  %v1725_v35 = vld [vmem:[%s3589_s2 + $0x78] sm:$0xff]  ;;  %v1724_v36 = vld [vmem:[%s3589_s2 + $0x70] sm:$0xff] }
 0x141   : > { %v1203_v38 = vpop.f32.mrf.mxu1  ;;  %v1066_v40 = vpop.f32.mrf.mxu0  ;;  %2536 = vmatpush3.msra.mxu0 %v1725_v35  ;;  %v1717_v49 = vld [vmem:[%s3589_s2 + $0x38] sm:$0xff]  ;;  %v1716_v52 = vld [vmem:[%s3589_s2 + $0x30] sm:$0xff] }
 0x142   : > { %v1321_v42 = vmax.f32 %v1203_v38, 0.0  ;;  %1588 = vadd.xlane.f32.xlu1 %v1587_v37  ;;  %1527 = vadd.xlane.f32.xlu0 %v1526_v34  ;;  %v1351_v61 = vmax.f32 %v1066_v40, 0.0  ;;  %v1723_v37 = vld [vmem:[%s3589_s2 + $0x68] sm:$0xff]  ;;  %v1722_v40 = vld [vmem:[%s3589_s2 + $0x60] sm:$0xff] }
 0x143   : > { %v1207_v45 = vpop.f32.mrf.mxu1  ;;  %v1070_v46 = vpop.f32.mrf.mxu0  ;;  %2537 = vmatprep.subr.mxu0 %v2726_v0 }
 0x144   : > { %v1590_v47 = vadd.f32 %v1321_v42, %v1320_v41  ;;  %v1328_v50 = vmax.f32 %v1207_v45, 0.0  ;;  %v1358_v4 = vmax.f32 %v1070_v46, 0.0  ;;  %v1538_v8 = vadd.f32 %v1351_v61, %v1350_v58  ;;  %2538 = vmatpush3.msra.mxu0 %v1724_v36  ;;  %v1721_v41 = vld [vmem:[%s3589_s2 + $0x58] sm:$0xff]  ;;  %v1719_v45 = vld [vmem:[%s3589_s2 + $0x48] sm:$0xff] }
 0x145   : > { %v1209_v48 = vpop.f32.mrf.mxu1  ;;  %v1072_v55 = vpop.f32.mrf.mxu0  ;;  %2539 = vmatprep.subr.mxu0 %v2726_v0  ;;  %v1711_v61 = vld [vmem:[%s3589_s2 + $0x8] sm:$0xff] }
 0x146   : > { %v1329_v51 = vmax.f32 %v1209_v48, 0.0  ;;  %1591 = vadd.xlane.f32.xlu1 %v1590_v47  ;;  %1530 = vadd.xlane.f32.xlu0 %v1529_v44  ;;  %v1359_v7 = vmax.f32 %v1072_v55, 0.0  ;;  %v1720_v44 = vld [vmem:[%s3589_s2 + $0x50] sm:$0xff]  ;;  %v1718_v48 = vld [vmem:[%s3589_s2 + $0x40] sm:$0xff] }
 0x147   : > { %v1213_v54 = vpop.f32.mrf.mxu1  ;;  %v1076_v1 = vpop.f32.mrf.mxu0  ;;  %2540 = vmatpush3.msra.mxu0 %v1723_v37 }
 0x148   : > { %v1593_v56 = vadd.f32 %v1329_v51, %v1328_v50  ;;  %v1336_v59 = vmax.f32 %v1213_v54, 0.0  ;;  %v1366_v13 = vmax.f32 %v1076_v1, 0.0  ;;  %v1541_v17 = vadd.f32 %v1359_v7, %v1358_v4  ;;  %2541 = vmatprep.subr.mxu0 %v2726_v0  ;;  %v1710_v1 = vld [vmem:[%s3589_s2] sm:$0xff] }
 0x149   : > { %v1215_v57 = vpop.f32.mrf.mxu1  ;;  %v1078_v10 = vpop.f32.mrf.mxu0  ;;  %2542 = vmatpush3.msra.mxu0 %v1722_v40 }
 0x14a   : > { %v1337_v60 = vmax.f32 %v1215_v57, 0.0  ;;  %1594 = vadd.xlane.f32.xlu1 %v1593_v56  ;;  %1533 = vadd.xlane.f32.xlu0 %v1532_v53  ;;  %v1367_v16 = vmax.f32 %v1078_v10, 0.0  ;;  %v1715_v53 = vld [vmem:[%s3589_s2 + $0x28] sm:$0xff]  ;;  %v1714_v56 = vld [vmem:[%s3589_s2 + $0x20] sm:$0xff]  ;;  %v1713_v57 = vld [vmem:[%s3589_s2 + $0x18] sm:$0xff] }
 0x14b   : > { %v1219_v63 = vpop.f32.mrf.mxu1  ;;  %2543 = vmatprep.subr.mxu0 %v2726_v0 }
 0x14c   : > { %v1596_v2 = vadd.f32 %v1337_v60, %v1336_v59  ;;  %v1344_v5 = vmax.f32 %v1219_v63, 0.0  ;;  %v1544_v23 = vadd.f32 %v1367_v16, %v1366_v13  ;;  %2544 = vmatpush3.msra.mxu0 %v1721_v41  ;;  %v1712_v60 = vld [vmem:[%s3589_s2 + $0x10] sm:$0xff] }
 0x14d   : > { %v1221_v3 = vpop.f32.mrf.mxu1  ;;  %2545 = vmatprep.subr.mxu0 %v2726_v0 }
 0x14e   : > { %v1345_v6 = vmax.f32 %v1221_v3, 0.0  ;;  %1597 = vadd.xlane.f32.xlu1 %v1596_v2  ;;  %1536 = vadd.xlane.f32.xlu0 %v1535_v62 }
 0x14f   : > { %v1225_v9 = vpop.f32.mrf.mxu1  ;;  %2546 = vmatpush3.msra.mxu0 %v1720_v44 }
 0x150   : > { %v1599_v11 = vadd.f32 %v1345_v6, %v1344_v5  ;;  %v1352_v14 = vmax.f32 %v1225_v9, 0.0  ;;  %2547 = vmatprep.subr.mxu0 %v2726_v0 }
 0x151   : > { %v1227_v12 = vpop.f32.mrf.mxu1  ;;  %2548 = vmatpush3.msra.mxu0 %v1719_v45 }
 0x152   : > { %v1353_v15 = vmax.f32 %v1227_v12, 0.0  ;;  %1600 = vadd.xlane.f32.xlu1 %v1599_v11  ;;  %1539 = vadd.xlane.f32.xlu0 %v1538_v8 }
 0x153   : > { %v1231_v18 = vpop.f32.mrf.mxu1  ;;  %2549 = vmatprep.subr.mxu0 %v2726_v0 }
 0x154   : > { %v1602_v19 = vadd.f32 %v1353_v15, %v1352_v14  ;;  %v1360_v21 = vmax.f32 %v1231_v18, 0.0  ;;  %2550 = vmatpush3.msra.mxu0 %v1718_v48 }
 0x155   : > { %v1233_v20 = vpop.f32.mrf.mxu1  ;;  %2551 = vmatprep.subr.mxu0 %v2726_v0 }
 0x156   : > { %v1361_v22 = vmax.f32 %v1233_v20, 0.0  ;;  %1603 = vadd.xlane.f32.xlu1 %v1602_v19  ;;  %1542 = vadd.xlane.f32.xlu0 %v1541_v17 }
 0x157   : > { %v1237_v24 = vpop.f32.mrf.mxu1  ;;  %2552 = vmatpush3.msra.mxu0 %v1717_v49 }
 0x158   : > { %v1605_v25 = vadd.f32 %v1361_v22, %v1360_v21  ;;  %v1368_v27 = vmax.f32 %v1237_v24, 0.0  ;;  %2553 = vmatprep.subr.mxu0 %v2726_v0  ;;  %v1850_v24 = vld [vmem:[%s3592_s5 + $0x78] sm:$0xff] }
 0x159   : > { %v1239_v26 = vpop.f32.mrf.mxu1  ;;  %2554 = vmatpush3.msra.mxu0 %v1716_v52  ;;  %2571 = vmatpush3.msra.mxu1 %v1850_v24 }
 0x15a   : > { %v1369_v28 = vmax.f32 %v1239_v26, 0.0  ;;  %1606 = vadd.xlane.f32.xlu1 %v1605_v25  ;;  %1545 = vadd.xlane.f32.xlu0 %v1544_v23 }
 0x15b   : > { %2555 = vmatprep.subr.mxu0 %v2726_v0  ;;  %2572 = vmatprep.subr.mxu1 %v2726_v0 }
 0x15c   : > { %v1608_v29 = vadd.f32 %v1369_v28, %v1368_v27  ;;  %2556 = vmatpush3.msra.mxu0 %v1715_v53 }
 0x15d   : > { %2557 = vmatprep.subr.mxu0 %v2726_v0 }
 0x15e   : > { %1609 = vadd.xlane.f32.xlu1 %v1608_v29  ;;  %2558 = vmatpush3.msra.mxu0 %v1714_v56 }
 0x15f   : > { %2559 = vmatprep.subr.mxu0 %v2726_v0 }
 0x160   : > { %2560 = vmatpush3.msra.mxu0 %v1713_v57 }
 0x161   : > { %2561 = vmatprep.subr.mxu0 %v2726_v0 }
 0x162   : > { %2562 = vmatpush3.msra.mxu0 %v1712_v60 }
 0x163   : > { %v3106_v30 = vpop.xlane.xlu1 %1413  ;;  %v3108_v31 = vpop.xlane.xlu0 %1371  ;;  %2563 = vmatprep.subr.mxu0 %v2726_v0 }
 0x164   : > { %2564 = vmatpush3.msra.mxu0 %v1711_v61  ;;  %v1419_v18 = vmul.f32 0.00390625, %v3108_v31 }
 0x165   : > { %2565 = vmatprep.subr.mxu0 %v2726_v0 }
 0x166   : > { %2566 = vmatpush3.msra.mxu0 %v1710_v1 }
 0x167   : > { %v3110_v32 = vpop.xlane.xlu1 %1374  ;;  %2605 = vmatprep.subr.mxu0 %v2726_v0 }
 0x168   : > { %v1420_v27 = vmul.f32 0.00390625, %v3110_v32 }
 0x16b   : > { %v3112_v33 = vpop.xlane.xlu0 %1436  ;;  %v3114_v34 = vpop.xlane.xlu1 %1416 }
 0x16c   : > { %v1483_v16 = vmul.f32 0.00390625, %v3112_v33 }
 0x16e   : > { %v1628_v23 = vsel %vm1627_vm3, %v1419_v18, %v1483_v16 }
 0x16f   : > { %v3130_v38 = vpop.xlane.xlu0 %1439  ;;  %v3132_v39 = vpop.xlane.xlu1 %1377 }
 0x170   : > { %v1484_v21 = vmul.f32 0.00390625, %v3130_v38  ;;  %v1421_v40 = vmul.f32 0.00390625, %v3132_v39 }
 0x172   : > { %v1629_v33 = vsel %vm1627_vm3, %v1420_v27, %v1484_v21 }
 0x173   : > { %v3142_v42 = vpop.xlane.xlu0 %1442  ;;  %v3144_v43 = vpop.xlane.xlu1 %1380 }
 0x174   : > { %v1485_v35 = vmul.f32 0.00390625, %v3142_v42  ;;  %v1422_v53 = vmul.f32 0.00390625, %v3144_v43 }
 0x176   : > { %v1630_v45 = vsel %vm1627_vm3, %v1421_v40, %v1485_v35 }
 0x177   : > { %v3154_v46 = vpop.xlane.xlu0 %1445  ;;  %v3156_v47 = vpop.xlane.xlu1 %1383 }
 0x178   : > { %v1486_v48 = vmul.f32 0.00390625, %v3154_v46  ;;  %v1423_v46 = vmul.f32 0.00390625, %v3156_v47 }
 0x17a   : > { %v1631_v60 = vsel %vm1627_vm3, %v1422_v53, %v1486_v48 }
 0x17b   : > { %v3166_v50 = vpop.xlane.xlu0 %1448  ;;  %v3168_v51 = vpop.xlane.xlu1 %1386 }
 0x17c   : > { %v1487_v61 = vmul.f32 0.00390625, %v3166_v50  ;;  %v1424_v50 = vmul.f32 0.00390625, %v3168_v51 }
 0x17e   : > { %v1632_v43 = vsel %vm1627_vm3, %v1423_v46, %v1487_v61 }
 0x17f   : > { %v3178_v54 = vpop.xlane.xlu0 %1451  ;;  %v3180_v55 = vpop.xlane.xlu1 %1389 }
 0x180   : > { %v1488_v18 = vmul.f32 0.00390625, %v3178_v54  ;;  %v1425_v54 = vmul.f32 0.00390625, %v3180_v55 }
 0x182   : > { %v1633_v47 = vsel %vm1627_vm3, %v1424_v50, %v1488_v18 }
 0x183   : > { %v3190_v58 = vpop.xlane.xlu0 %1454  ;;  %v3192_v59 = vpop.xlane.xlu1 %1392 }
 0x187   : > { %v3202_v62 = vpop.xlane.xlu0 %1457  ;;  %v3204_v63 = vpop.xlane.xlu1 %1395 }
 0x18b   : > { %v3211_v2 = vpop.xlane.xlu0 %1460  ;;  %v3213_v3 = vpop.xlane.xlu1 %1398 }
 0x18c   : > { %v1491_v48 = vmul.f32 0.00390625, %v3211_v2  ;;  %v1428_v2 = vmul.f32 0.00390625, %v3213_v3 }
 0x18f   : > { %v3216_v4 = vpop.xlane.xlu0 %1463  ;;  %v3218_v5 = vpop.xlane.xlu1 %1401 }
 0x193   : > { %v3220_v6 = vpop.xlane.xlu0 %1466  ;;  %v3222_v7 = vpop.xlane.xlu1 %1404 }
 0x197   : > { %v3224_v8 = vpop.xlane.xlu0 %1469  ;;  %v3226_v9 = vpop.xlane.xlu1 %1407 }
 0x19b   : > { %v3228_v10 = vpop.xlane.xlu0 %1472  ;;  %v3230_v12 = vpop.xlane.xlu1 %1410 }
 0x19f   : > { %v1504_v11 = vpop.xlane.xlu0 %1503  ;;  %v1501_v14 = vpop.xlane.xlu1 %1500 }
 0x1a0   : > { %v1547_v17 = vmul.f32 0.00390625, %v1501_v14  ;;  %v1548_v25 = vmul.f32 0.00390625, %v1504_v11 }
 0x1a2   : > { %v1645_v26 = vsel %vm1644_vm4, %v1628_v23, %v1547_v17  ;;  %v1646_v38 = vsel %vm1644_vm4, %v1629_v33, %v1548_v25 }
 0x1a3   : > { %v3232_v13 = vpop.xlane.xlu0 %1475 }
 0x1a7   : > { %v1507_v15 = vpop.xlane.xlu0 %1506 }
 0x1a8   : > { %v1549_v37 = vmul.f32 0.00390625, %v1507_v15 }
 0x1aa   : > { %v1647_v42 = vsel %vm1644_vm4, %v1630_v45, %v1549_v37 }
 0x1ab   : > { %v1565_v19 = vpop.xlane.xlu1 %1564  ;;  %v3236_v20 = vpop.xlane.xlu0 %1478 }
 0x1ac   : > { %v1611_v22 = vmul.f32 0.00390625, %v1565_v19 }
 0x1ae   : > { %v1662_v28 = vsel %vm1661_vm5, %v1645_v26, %v1611_v22  ;;  %v1489_v26 = vmul.f32 0.00390625, %v3190_v58  ;;  %v1426_v58 = vmul.f32 0.00390625, %v3192_v59 }
 0x1af   : > { %v1568_v29 = vpop.xlane.xlu1 %1567  ;;  %v1510_v31 = vpop.xlane.xlu0 %1509  ;;  %1678 = vxpose.xlu0.b32.start [1/16] (narrow) %v1662_v28, 8 }
 0x1b0   : > { %v1612_v36 = vmul.f32 0.00390625, %v1568_v29  ;;  %v1550_v52 = vmul.f32 0.00390625, %v1510_v31  ;;  %v1634_v51 = vsel %vm1627_vm3, %v1425_v54, %v1489_v26 }
 0x1b2   : > { %v1663_v41 = vsel %vm1661_vm5, %v1646_v38, %v1612_v36  ;;  %v1648_v14 = vsel %vm1644_vm4, %v1631_v60, %v1550_v52  ;;  %v1490_v36 = vmul.f32 0.00390625, %v3202_v62  ;;  %v1427_v62 = vmul.f32 0.00390625, %v3204_v63 }
 0x1b3   : > { %v1571_v32 = vpop.xlane.xlu1 %1570  ;;  %v3252_v44 = vpop.xlane.xlu0 %1481  ;;  %1679 = vxpose.xlu0.b32.cont [2/16] (narrow) %v1663_v41, 8 }
 0x1b4   : > { %v1613_v49 = vmul.f32 0.00390625, %v1571_v32  ;;  %v1635_v55 = vsel %vm1627_vm3, %v1426_v58, %v1490_v36  ;;  %v1636_v59 = vsel %vm1627_vm3, %v1427_v62, %v1491_v48  ;;  %v1498_v62 = vmul.f32 0.00390625, %v3252_v44  ;;  %v1848_v44 = vld [vmem:[%s3592_s5 + $0x68] sm:$0xff] }
 0x1b6   : > { %v1664_v56 = vsel %vm1661_vm5, %v1647_v42, %v1613_v49 }
 0x1b7   : > { %v1574_v57 = vpop.xlane.xlu1 %1573  ;;  %v1513_v39 = vpop.xlane.xlu0 %1512  ;;  %1680 = vxpose.xlu0.b32.cont [3/16] (narrow) %v1664_v56, 8 }
 0x1b8   : > { %v1614_v1 = vmul.f32 0.00390625, %v1574_v57  ;;  %v1551_v11 = vmul.f32 0.00390625, %v1513_v39  ;;  %v1492_v39 = vmul.f32 0.00390625, %v3216_v4  ;;  %v1429_v4 = vmul.f32 0.00390625, %v3218_v5 }
 0x1ba   : > { %v1665_v15 = vsel %vm1661_vm5, %v1648_v14, %v1614_v1  ;;  %v1649_v22 = vsel %vm1644_vm4, %v1632_v43, %v1551_v11  ;;  %v1637_v63 = vsel %vm1627_vm3, %v1428_v2, %v1492_v39 }
 0x1bb   : > { %v1577_v16 = vpop.xlane.xlu1 %1576  ;;  %v1516_v17 = vpop.xlane.xlu0 %1515  ;;  %1681 = vxpose.xlu0.b32.cont [4/16] (narrow) %v1665_v15, 8  ;;  %v1493_v15 = vmul.f32 0.00390625, %v3220_v6  ;;  %v1430_v6 = vmul.f32 0.00390625, %v3222_v7 }
 0x1bc   : > { %v1615_v19 = vmul.f32 0.00390625, %v1577_v16  ;;  %v1552_v21 = vmul.f32 0.00390625, %v1516_v17 }
 0x1bd   : > { %v1638_v3 = vsel %vm1627_vm3, %v1429_v4, %v1493_v15  ;;  %v1843_v15 = vld [vmem:[%s3592_s5 + $0x40] sm:$0xff] }
 0x1be   : > { %v1666_v23 = vsel %vm1661_vm5, %v1649_v22, %v1615_v19  ;;  %v1650_v29 = vsel %vm1644_vm4, %v1633_v47, %v1552_v21  ;;  %v1494_v22 = vmul.f32 0.00390625, %v3224_v8  ;;  %v1431_v8 = vmul.f32 0.00390625, %v3226_v9  ;;  %v1839_v4 = vld [vmem:[%s3592_s5 + $0x20] sm:$0xff] }
 0x1bf   : > { %v1580_v24 = vpop.xlane.xlu1 %1579  ;;  %v1519_v25 = vpop.xlane.xlu0 %1518  ;;  %1682 = vxpose.xlu0.b32.cont [5/16] (narrow) %v1666_v23, 8 }
 0x1c0   : > { %v1616_v27 = vmul.f32 0.00390625, %v1580_v24  ;;  %v1553_v28 = vmul.f32 0.00390625, %v1519_v25  ;;  %v1639_v5 = vsel %vm1627_vm3, %v1430_v6, %v1494_v22 }
 0x1c2   : > { %v1667_v31 = vsel %vm1661_vm5, %v1650_v29, %v1616_v27  ;;  %v1651_v40 = vsel %vm1644_vm4, %v1634_v51, %v1553_v28  ;;  %v1495_v27 = vmul.f32 0.00390625, %v3228_v10  ;;  %v1496_v51 = vmul.f32 0.00390625, %v3232_v13 }
 0x1c3   : > { %v1583_v33 = vpop.xlane.xlu1 %1582  ;;  %v1522_v35 = vpop.xlane.xlu0 %1521  ;;  %1683 = vxpose.xlu0.b32.cont [6/16] (narrow) %v1667_v31, 8  ;;  %v1432_v10 = vmul.f32 0.00390625, %v3230_v12  ;;  %v1433_v13 = vmul.f32 0.00390625, %v3106_v30 }
 0x1c4   : > { %v1617_v37 = vmul.f32 0.00390625, %v1583_v33  ;;  %v1554_v38 = vmul.f32 0.00390625, %v1522_v35  ;;  %v1640_v7 = vsel %vm1627_vm3, %v1431_v8, %v1495_v27 }
 0x1c5   : > { %v1641_v9 = vsel %vm1627_vm3, %v1432_v10, %v1496_v51  ;;  %v2447_v10 = vld [vmem:[%s3590_s3] ss:$0 sm:$0xff] }
 0x1c6   : > { %v1668_v41 = vsel %vm1661_vm5, %v1651_v40, %v1617_v37  ;;  %v1652_v42 = vsel %vm1644_vm4, %v1635_v55, %v1554_v38 }
 0x1c7   : > { %v1586_v32 = vpop.xlane.xlu1 %1585  ;;  %v1525_v45 = vpop.xlane.xlu0 %1524  ;;  %1684 = vxpose.xlu0.b32.cont [7/16] (narrow) %v1668_v41, 8 }
 0x1c8   : > { %v1618_v49 = vmul.f32 0.00390625, %v1586_v32  ;;  %v1555_v52 = vmul.f32 0.00390625, %v1525_v45  ;;  %v1497_v32 = vmul.f32 0.00390625, %v3236_v20  ;;  %v1434_v20 = vmul.f32 0.00390625, %v3114_v34  ;;  %v1849_v34 = vld [vmem:[%s3592_s5 + $0x70] sm:$0xff] }
 0x1c9   : > { %2573 = vmatpush3.msra.mxu1 %v1849_v34 }
 0x1ca   : > { %v1669_v53 = vsel %vm1661_vm5, %v1652_v42, %v1618_v49  ;;  %v1653_v1 = vsel %vm1644_vm4, %v1636_v59, %v1555_v52  ;;  %v1642_v42 = vsel %vm1627_vm3, %v1433_v13, %v1497_v32  ;;  %v1643_v30 = vsel %vm1627_vm3, %v1434_v20, %v1498_v62  ;;  %2574 = vmatprep.subr.mxu1 %v2726_v0  ;;  %v1971_v13 = vld [vmem:[%s3595_s8 + $0x60] sm:$0xff]  ;;  %v1966_v62 = vld [vmem:[%s3595_s8 + $0x38] sm:$0xff] }
 0x1cb   : > { %v1589_v56 = vpop.xlane.xlu1 %1588  ;;  %v1528_v57 = vpop.xlane.xlu0 %1527  ;;  %1685 = vxpose.xlu0.b32.cont [8/16] (narrow) %v1669_v53, 8  ;;  %2575 = vmatpush3.msra.mxu1 %v1848_v44  ;;  %v1962_v20 = vld [vmem:[%s3595_s8 + $0x18] sm:$0xff] }
 0x1cc   : > { %v1619_v60 = vmul.f32 0.00390625, %v1589_v56  ;;  %v1556_v61 = vmul.f32 0.00390625, %v1528_v57  ;;  %2576 = vmatprep.subr.mxu1 %v2726_v0 }
 0x1ce   : > { %v1670_v11 = vsel %vm1661_vm5, %v1653_v1, %v1619_v60  ;;  %v1654_v43 = vsel %vm1644_vm4, %v1637_v63, %v1556_v61  ;;  %v1844_v63 = vld [vmem:[%s3592_s5 + $0x48] sm:$0xff] }
 0x1cf   : > { %v1592_v14 = vpop.xlane.xlu1 %1591  ;;  %v1531_v46 = vpop.xlane.xlu0 %1530  ;;  %1686 = vxpose.xlu0.b32.cont [9/16] (narrow) %v1670_v11, 8  ;;  %v1847_v11 = vld [vmem:[%s3592_s5 + $0x60] sm:$0xff] }
 0x1d0   : > { %v1620_v16 = vmul.f32 0.00390625, %v1592_v14  ;;  %v1557_v17 = vmul.f32 0.00390625, %v1531_v46  ;;  %2577 = vmatpush3.msra.mxu1 %v1847_v11  ;;  %v1846_v14 = vld [vmem:[%s3592_s5 + $0x58] sm:$0xff]  ;;  %v1845_v46 = vld [vmem:[%s3592_s5 + $0x50] sm:$0xff] }
 0x1d1   : > { %2578 = vmatprep.subr.mxu1 %v2726_v0 }
 0x1d2   : > { %v1671_v18 = vsel %vm1661_vm5, %v1654_v43, %v1620_v16  ;;  %v1655_v24 = vsel %vm1644_vm4, %v1638_v3, %v1557_v17  ;;  %2579 = vmatpush3.msra.mxu1 %v1846_v14  ;;  %v1842_v16 = vld [vmem:[%s3592_s5 + $0x38] sm:$0xff]  ;;  %v1841_v17 = vld [vmem:[%s3592_s5 + $0x30] sm:$0xff]  ;;  %v1840_v43 = vld [vmem:[%s3592_s5 + $0x28] sm:$0xff] }
 0x1d3   : > { %v1595_v19 = vpop.xlane.xlu1 %1594  ;;  %v1534_v21 = vpop.xlane.xlu0 %1533  ;;  %1687 = vxpose.xlu0.b32.cont [10/16] (narrow) %v1671_v18, 8  ;;  %2580 = vmatprep.subr.mxu1 %v2726_v0  ;;  %v1838_v18 = vld [vmem:[%s3592_s5 + $0x18] sm:$0xff]  ;;  %v1835_v3 = vld [vmem:[%s3592_s5] sm:$0xff] }
 0x1d4   : > { %v1621_v50 = vmul.f32 0.00390625, %v1595_v19  ;;  %v1558_v23 = vmul.f32 0.00390625, %v1534_v21  ;;  %2581 = vmatpush3.msra.mxu1 %v1845_v46  ;;  %v1837_v19 = vld [vmem:[%s3592_s5 + $0x10] sm:$0xff]  ;;  %v1836_v21 = vld [vmem:[%s3592_s5 + $0x8] sm:$0xff] }
 0x1d5   : > { %2582 = vmatprep.subr.mxu1 %v2726_v0 }
 0x1d6   : > { %v1672_v25 = vsel %vm1661_vm5, %v1655_v24, %v1621_v50  ;;  %v1656_v54 = vsel %vm1644_vm4, %v1639_v5, %v1558_v23  ;;  %2583 = vmatpush3.msra.mxu1 %v1844_v63 }
 0x1d7   : > { %v1598_v47 = vpop.xlane.xlu1 %1597  ;;  %v1537_v26 = vpop.xlane.xlu0 %1536  ;;  %1688 = vxpose.xlu0.b32.cont [11/16] (narrow) %v1672_v25, 8  ;;  %2584 = vmatprep.subr.mxu1 %v2726_v0 }
 0x1d8   : > { %v1622_v28 = vmul.f32 0.00390625, %v1598_v47  ;;  %v1559_v29 = vmul.f32 0.00390625, %v1537_v26  ;;  %2585 = vmatpush3.msra.mxu1 %v1843_v15 }
 0x1d9   : > { %2586 = vmatprep.subr.mxu1 %v2726_v0 }
 0x1da   : > { %v1673_v31 = vsel %vm1661_vm5, %v1656_v54, %v1622_v28  ;;  %v1657_v38 = vsel %vm1644_vm4, %v1640_v7, %v1559_v29  ;;  %2587 = vmatpush3.msra.mxu1 %v1842_v16 }
 0x1db   : > { %v1601_v33 = vpop.xlane.xlu1 %1600  ;;  %v1540_v35 = vpop.xlane.xlu0 %1539  ;;  %1689 = vxpose.xlu0.b32.cont [12/16] (narrow) %v1673_v31, 8  ;;  %2588 = vmatprep.subr.mxu1 %v2726_v0 }
 0x1dc   : > { %v1623_v36 = vmul.f32 0.00390625, %v1601_v33  ;;  %v1560_v37 = vmul.f32 0.00390625, %v1540_v35  ;;  %2589 = vmatpush3.msra.mxu1 %v1841_v17 }
 0x1dd   : > { %2590 = vmatprep.subr.mxu1 %v2726_v0 }
 0x1de   : > { %v1674_v40 = vsel %vm1661_vm5, %v1657_v38, %v1623_v36  ;;  %v1658_v48 = vsel %vm1644_vm4, %v1641_v9, %v1560_v37  ;;  %2591 = vmatpush3.msra.mxu1 %v1840_v43 }
 0x1df   : > { %v1604_v58 = vpop.xlane.xlu1 %1603  ;;  %v1543_v41 = vpop.xlane.xlu0 %1542  ;;  %1690 = vxpose.xlu0.b32.cont [13/16] (narrow) %v1674_v40, 8  ;;  %2592 = vmatprep.subr.mxu1 %v2726_v0 }
 0x1e0   : > { %v1624_v45 = vmul.f32 0.00390625, %v1604_v58  ;;  %v1561_v55 = vmul.f32 0.00390625, %v1543_v41  ;;  %2593 = vmatpush3.msra.mxu1 %v1839_v4  ;;  %v2448_v58 = vld [vmem:[%s3591_s4] ss:$0 sm:$0xff] }
 0x1e1   : > { %2594 = vmatprep.subr.mxu1 %v2726_v0 }
 0x1e2   : > { %v1675_v49 = vsel %vm1661_vm5, %v1658_v48, %v1624_v45  ;;  %v1659_v57 = vsel %vm1644_vm4, %v1642_v42, %v1561_v55  ;;  %2595 = vmatpush3.msra.mxu1 %v1838_v18  ;;  %v1974_v45 = vld [vmem:[%s3595_s8 + $0x78] sm:$0xff]  ;;  %v1973_v55 = vld [vmem:[%s3595_s8 + $0x70] sm:$0xff]  ;;  %v1972_v48 = vld [vmem:[%s3595_s8 + $0x68] sm:$0xff] }
 0x1e3   : > { %v1607_v52 = vpop.xlane.xlu1 %1606  ;;  %1691 = vxpose.xlu0.b32.cont [14/16] (narrow) %v1675_v49, 8  ;;  %v1546_v12 = vpop.xlane.xlu0 %1545  ;;  %2596 = vmatprep.subr.mxu1 %v2726_v0  ;;  %v1970_v49 = vld [vmem:[%s3595_s8 + $0x58] sm:$0xff]  ;;  %v1967_v42 = vld [vmem:[%s3595_s8 + $0x40] sm:$0xff] }
 0x1e4   : > { %v1625_v53 = vmul.f32 0.00390625, %v1607_v52  ;;  %v1562_v56 = vmul.f32 0.00390625, %v1546_v12  ;;  %2597 = vmatpush3.msra.mxu1 %v1837_v19  ;;  %v1969_v52 = vld [vmem:[%s3595_s8 + $0x50] sm:$0xff]  ;;  %v1968_v12 = vld [vmem:[%s3595_s8 + $0x48] sm:$0xff] }
 0x1e5   : > { %2598 = vmatprep.subr.mxu1 %v2726_v0 }
 0x1e6   : > { %v1676_v59 = vsel %vm1661_vm5, %v1659_v57, %v1625_v53  ;;  %v1660_v61 = vsel %vm1644_vm4, %v1643_v30, %v1562_v56  ;;  %2599 = vmatpush3.msra.mxu1 %v1836_v21  ;;  %v1965_v53 = vld [vmem:[%s3595_s8 + $0x30] sm:$0xff]  ;;  %v1964_v56 = vld [vmem:[%s3595_s8 + $0x28] sm:$0xff]  ;;  %v1963_v57 = vld [vmem:[%s3595_s8 + $0x20] sm:$0xff] }
 0x1e7   : > { %v1610_v39 = vpop.xlane.xlu1 %1609  ;;  %1692 = vxpose.xlu0.b32.cont [15/16] (narrow) %v1676_v59, 8  ;;  %2600 = vmatprep.subr.mxu1 %v2726_v0  ;;  %v1961_v59 = vld [vmem:[%s3595_s8 + $0x10] sm:$0xff]  ;;  %v1959_v30 = vld [vmem:[%s3595_s8] sm:$0xff] }
 0x1e8   : > { %v1626_v60 = vmul.f32 0.00390625, %v1610_v39  ;;  %2601 = vmatpush3.msra.mxu1 %v1835_v3  ;;  %v1960_v39 = vld [vmem:[%s3595_s8 + $0x8] sm:$0xff] }
 0x1e9   : > { %2640 = vmatprep.subr.mxu1 %v2726_v0 }
 0x1ea   : > { %v1677_v1 = vsel %vm1661_vm5, %v1660_v61, %v1626_v60 }
 0x1eb   : > { %1693 = vxpose.xlu0.b32.end [16/16] (narrow) %v1677_v1, 8 }
 0x22b   : > { %v1694_v2 = vpop.trf.xlu0 }
 0x22c   : > { %2568 = vmatmul.mubr.f32.vlgmr.msra.gmra.mxu0 %v1694_v2 }
 0x22d   : > { %2637 = vmatprep.mubr.msk.f32.mxu0 %vm2727_vm2, %v2726_v0  ;;  %2606 = vmatpush3.msra.mxu0 %v1974_v45 }
 0x22e   : > { %2607 = vmatprep.subr.mxu0 %v2726_v0 }
 0x22f   : > { %2608 = vmatpush3.msra.mxu0 %v1973_v55 }
 0x230   : > { %2609 = vmatprep.subr.mxu0 %v2726_v0 }
 0x231   : > { %2610 = vmatpush3.msra.mxu0 %v1972_v48 }
 0x232   : > { %2611 = vmatprep.subr.mxu0 %v2726_v0 }
 0x233   : > { %2612 = vmatpush3.msra.mxu0 %v1971_v13 }
 0x234   : > { %2613 = vmatprep.subr.mxu0 %v2726_v0 }
 0x235   : > { %2614 = vmatpush3.msra.mxu0 %v1970_v49 }
 0x236   : > { %2615 = vmatprep.subr.mxu0 %v2726_v0 }
 0x237   : > { %2616 = vmatpush3.msra.mxu0 %v1969_v52 }
 0x238   : > { %2617 = vmatprep.subr.mxu0 %v2726_v0 }
 0x239   : > { %2618 = vmatpush3.msra.mxu0 %v1968_v12 }
 0x23a   : > { %2619 = vmatprep.subr.mxu0 %v2726_v0 }
 0x23b   : > { %2620 = vmatpush3.msra.mxu0 %v1967_v42 }
 0x23c   : > { %2621 = vmatprep.subr.mxu0 %v2726_v0 }
 0x23d   : > { %2622 = vmatpush3.msra.mxu0 %v1966_v62 }
 0x23e   : > { %2623 = vmatprep.subr.mxu0 %v2726_v0 }
 0x23f   : > { %2624 = vmatpush3.msra.mxu0 %v1965_v53 }
 0x240   : > { %2625 = vmatprep.subr.mxu0 %v2726_v0 }
 0x241   : > { %2626 = vmatpush3.msra.mxu0 %v1964_v56 }
 0x242   : > { %2627 = vmatprep.subr.mxu0 %v2726_v0 }
 0x243   : > { %2628 = vmatpush3.msra.mxu0 %v1963_v57 }
 0x244   : > { %2629 = vmatprep.subr.mxu0 %v2726_v0 }
 0x245   : > { %2630 = vmatpush3.msra.mxu0 %v1962_v20 }
 0x246   : > { %2631 = vmatprep.subr.mxu0 %v2726_v0 }
 0x247   : > { %2632 = vmatpush3.msra.mxu0 %v1961_v59 }
 0x248   : > { %2633 = vmatprep.subr.mxu0 %v2726_v0 }
 0x249   : > { %2634 = vmatpush3.msra.mxu0 %v1960_v39 }
 0x24a   : > { %2635 = vmatprep.subr.mxu0 %v2726_v0 }
 0x24b   : > { %2636 = vmatpush3.msra.mxu0 %v1959_v30 }
 0x24c   : > { %2675 = vmatprep.subr.mxu0 %v2726_v0 }
 0x2ec   : > { %v1792_v22 = vpop.f32.mrf.mxu0 }
 0x2ed   : > { %v1798_v50 = vsel %vm581_vm0, %v1792_v22, 0.0 }
 0x2ee   : > { %v1799_v23 = vrot.slane %v1798_v50, 4  ;;  %v2569_v24 = vpop.f32.mrf.mxu0 }
 0x2ef   : > { %v2449_v24 = vld [vmem:[%s3593_s6] ss:$0 sm:$0xff] }
 0x2f0   : > { %v1800_v6 = vadd.f32 %v1799_v23, %v1798_v50 }
 0x2f2   : > { %v1801_v25 = vrot.slane %v1800_v6, 2 }
 0x2f4   : > { %v1802_v47 = vadd.f32 %v1801_v25, %v1800_v6  ;;  %v2450_v25 = vld [vmem:[%s3594_s7] ss:$0 sm:$0xff] }
 0x2f6   : > { %v1803_v26 = vrot.slane %v1802_v47, 1 }
 0x2f8   : > { %v1804_v5 = vadd.f32 %v1803_v26, %v1802_v47 }
 0x2fa   : > { %v1806_v27 = vmul.f32 0.25, %v1804_v5 }
 0x2fc   : > { %v1807_v28 = vsub.f32 %v1792_v22, %v1806_v27  ;;  %v2082_v27 = vld [vmem:[%s3596_s9 + $0x78] sm:$0xff] }
 0x2fe   : > { %v1808_v29 = vmul.f32 %v1807_v28, %v1807_v28 }
 0x300   : > { %v1809_v54 = vsel %vm581_vm0, %v1808_v29, 0.0  ;;  %v2080_v29 = vld [vmem:[%s3596_s9 + $0x68] sm:$0xff] }
 0x301   : > { %v1810_v8 = vrot.slane %v1809_v54, 4 }
 0x303   : > { %v1811_v31 = vadd.f32 %v1810_v8, %v1809_v54  ;;  %v2079_v54 = vld [vmem:[%s3596_s9 + $0x60] sm:$0xff]  ;;  %v2078_v8 = vld [vmem:[%s3596_s9 + $0x58] sm:$0xff] }
 0x305   : > { %v1812_v33 = vrot.slane %v1811_v31, 2 }
 0x307   : > { %v1813_v35 = vadd.f32 %v1812_v33, %v1811_v31  ;;  %v2077_v31 = vld [vmem:[%s3596_s9 + $0x50] sm:$0xff]  ;;  %v2076_v33 = vld [vmem:[%s3596_s9 + $0x48] sm:$0xff] }
 0x309   : > { %v1814_v7 = vrot.slane %v1813_v35, 1 }
 0x30b   : > { %v1815_v51 = vadd.f32 %v1814_v7, %v1813_v35  ;;  %v2075_v35 = vld [vmem:[%s3596_s9 + $0x40] sm:$0xff]  ;;  %v2074_v7 = vld [vmem:[%s3596_s9 + $0x38] sm:$0xff] }
 0x30d   : > { %v1816_v36 = vmul.f32 0.25, %v1815_v51  ;;  %v2073_v51 = vld [vmem:[%s3596_s9 + $0x30] sm:$0xff] }
 0x30f   : > { %v1817_v37 = vadd.f32 1e-05, %v1816_v36  ;;  %v2072_v36 = vld [vmem:[%s3596_s9 + $0x28] sm:$0xff] }
 0x311   : > { %2710 = vrsqrt.f32 %v1817_v37  ;;  %v2071_v37 = vld [vmem:[%s3596_s9 + $0x20] sm:$0xff] }
 0x31e   : > { %v2711_v38 = vpop.eup %2710 }
 0x31f   : > { %v1819_v40 = vmul.f32 %v2711_v38, %v1807_v28  ;;  %v2081_v28 = vld [vmem:[%s3596_s9 + $0x70] sm:$0xff]  ;;  %v2070_v38 = vld [vmem:[%s3596_s9 + $0x18] sm:$0xff] }
 0x321   : > { %v1826_v41 = vmul.f32 %v2447_v10, %v1819_v40  ;;  %v2069_v10 = vld [vmem:[%s3596_s9 + $0x10] sm:$0xff]  ;;  %v2068_v40 = vld [vmem:[%s3596_s9 + $0x8] sm:$0xff] }
 0x323   : > { %v1833_v9 = vadd.f32 %v2448_v58, %v1826_v41  ;;  %v2067_v58 = vld [vmem:[%s3596_s9] sm:$0xff] }
 0x325   : > { %v1834_v32 = vmax.f32 %v1833_v9, 0.0 }
 0x327   : > { %2603 = vmatmul.mubr.f32.vlgmr.msra.gmra.mxu1 %v1834_v32 }
 0x328   : > { %2672 = vmatprep.mubr.msk.f32.mxu1 %vm2727_vm2, %v2726_v0  ;;  %2641 = vmatpush3.msra.mxu1 %v2082_v27 }
 0x329   : > { %2642 = vmatprep.subr.mxu1 %v2726_v0 }
 0x32a   : > { %2643 = vmatpush3.msra.mxu1 %v2081_v28 }
 0x32b   : > { %2644 = vmatprep.subr.mxu1 %v2726_v0 }
 0x32c   : > { %2645 = vmatpush3.msra.mxu1 %v2080_v29 }
 0x32d   : > { %2646 = vmatprep.subr.mxu1 %v2726_v0 }
 0x32e   : > { %2647 = vmatpush3.msra.mxu1 %v2079_v54 }
 0x32f   : > { %2648 = vmatprep.subr.mxu1 %v2726_v0 }
 0x330   : > { %2649 = vmatpush3.msra.mxu1 %v2078_v8 }
 0x331   : > { %2650 = vmatprep.subr.mxu1 %v2726_v0 }
 0x332   : > { %2651 = vmatpush3.msra.mxu1 %v2077_v31  ;;  %v2451_v31 = vld [vmem:[%s3597_s10] ss:$0 sm:$0xff] }
 0x333   : > { %2652 = vmatprep.subr.mxu1 %v2726_v0 }
 0x334   : > { %2653 = vmatpush3.msra.mxu1 %v2076_v33 }
 0x335   : > { %2654 = vmatprep.subr.mxu1 %v2726_v0 }
 0x336   : > { %2655 = vmatpush3.msra.mxu1 %v2075_v35  ;;  %v2452_v35 = vld [vmem:[%s3598_s11] ss:$0 sm:$0xff] }
 0x337   : > { %2656 = vmatprep.subr.mxu1 %v2726_v0 }
 0x338   : > { %2657 = vmatpush3.msra.mxu1 %v2074_v7 }
 0x339   : > { %2658 = vmatprep.subr.mxu1 %v2726_v0 }
 0x33a   : > { %2659 = vmatpush3.msra.mxu1 %v2073_v51 }
 0x33b   : > { %2660 = vmatprep.subr.mxu1 %v2726_v0 }
 0x33c   : > { %2661 = vmatpush3.msra.mxu1 %v2072_v36 }
 0x33d   : > { %2662 = vmatprep.subr.mxu1 %v2726_v0 }
 0x33e   : > { %2663 = vmatpush3.msra.mxu1 %v2071_v37  ;;  %v2453_v37 = vld [vmem:[%s3600_s13] ss:$0 sm:$0xff] }
 0x33f   : > { %2664 = vmatprep.subr.mxu1 %v2726_v0 }
 0x340   : > { %2665 = vmatpush3.msra.mxu1 %v2070_v38 }
 0x341   : > { %2666 = vmatprep.subr.mxu1 %v2726_v0 }
 0x342   : > { %2667 = vmatpush3.msra.mxu1 %v2069_v10 }
 0x343   : > { %2668 = vmatprep.subr.mxu1 %v2726_v0 }
 0x344   : > { %2669 = vmatpush3.msra.mxu1 %v2068_v40 }
 0x345   : > { %2670 = vmatprep.subr.mxu1 %v2726_v0 }
 0x346   : > { %2671 = vmatpush3.msra.mxu1 %v2067_v58 }
 0x3e7   : > { %v1917_v60 = vpop.f32.mrf.mxu1 }
 0x3e8   : > { %v1923_v61 = vsel %vm581_vm0, %v1917_v60, 0.0 }
 0x3e9   : > { %v1924_v1 = vrot.slane %v1923_v61, 4  ;;  %v2604_v2 = vpop.f32.mrf.mxu1 }
 0x3eb   : > { %v1925_v34 = vadd.f32 %v1924_v1, %v1923_v61 }
 0x3ed   : > { %v1926_v44 = vrot.slane %v1925_v34, 2 }
 0x3ef   : > { %v1927_v11 = vadd.f32 %v1926_v44, %v1925_v34  ;;  %v2199_v34 = vld [vmem:[%s3599_s12 + $0x38] sm:$0xff]  ;;  %v2198_v44 = vld [vmem:[%s3599_s12 + $0x30] sm:$0xff] }
 0x3f1   : > { %v1928_v14 = vrot.slane %v1927_v11, 1 }
 0x3f3   : > { %v1929_v46 = vadd.f32 %v1928_v14, %v1927_v11  ;;  %v2197_v11 = vld [vmem:[%s3599_s12 + $0x28] sm:$0xff]  ;;  %v2196_v14 = vld [vmem:[%s3599_s12 + $0x20] sm:$0xff] }
 0x3f5   : > { %v1930_v63 = vmul.f32 0.25, %v1929_v46  ;;  %v2195_v46 = vld [vmem:[%s3599_s12 + $0x18] sm:$0xff] }
 0x3f7   : > { %v1931_v15 = vsub.f32 %v1917_v60, %v1930_v63  ;;  %v2194_v63 = vld [vmem:[%s3599_s12 + $0x10] sm:$0xff] }
 0x3f9   : > { %v1932_v16 = vmul.f32 %v1931_v15, %v1931_v15 }
 0x3fb   : > { %v1933_v17 = vsel %vm581_vm0, %v1932_v16, 0.0  ;;  %v2192_v16 = vld [vmem:[%s3599_s12] sm:$0xff] }
 0x3fc   : > { %v1934_v43 = vrot.slane %v1933_v17, 4 }
 0x3fe   : > { %v1935_v4 = vadd.f32 %v1934_v43, %v1933_v17 }
 0x400   : > { %v1936_v18 = vrot.slane %v1935_v4, 2 }
 0x402   : > { %v1937_v19 = vadd.f32 %v1936_v18, %v1935_v4 }
 0x404   : > { %v1938_v21 = vrot.slane %v1937_v19, 1 }
 0x406   : > { %v1939_v3 = vadd.f32 %v1938_v21, %v1937_v19 }
 0x408   : > { %v1940_v22 = vmul.f32 0.25, %v1939_v3 }
 0x40a   : > { %v1941_v50 = vadd.f32 1e-05, %v1940_v22 }
 0x40c   : > { %2712 = vrsqrt.f32 %v1941_v50 }
 0x419   : > { %v2713_v23 = vpop.eup %2712 }
 0x41a   : > { %v1943_v6 = vmul.f32 %v2713_v23, %v1931_v15  ;;  %v2193_v15 = vld [vmem:[%s3599_s12 + $0x8] sm:$0xff] }
 0x41c   : > { %v1950_v47 = vmul.f32 %v2449_v24, %v1943_v6 }
 0x41e   : > { %v1957_v26 = vadd.f32 %v2450_v25, %v1950_v47 }
 0x420   : > { %v1958_v5 = vmax.f32 %v1957_v26, 0.0 }
 0x422   : > { %2638 = vmatmul.mubr.f32.vlgmr.msra.gmra.mxu0 %v1958_v5 }
 0x423   : > { %2691 = vmatprep.mubr.msk.f32.mxu0 %vm2727_vm2, %v2726_v0  ;;  %2676 = vmatpush3.msra.mxu0 %v2199_v34 }
 0x424   : > { %2677 = vmatprep.subr.mxu0 %v2726_v0 }
 0x425   : > { %2678 = vmatpush3.msra.mxu0 %v2198_v44 }
 0x426   : > { %2679 = vmatprep.subr.mxu0 %v2726_v0 }
 0x427   : > { %2680 = vmatpush3.msra.mxu0 %v2197_v11 }
 0x428   : > { %2681 = vmatprep.subr.mxu0 %v2726_v0 }
 0x429   : > { %2682 = vmatpush3.msra.mxu0 %v2196_v14 }
 0x42a   : > { %2683 = vmatprep.subr.mxu0 %v2726_v0 }
 0x42b   : > { %2684 = vmatpush3.msra.mxu0 %v2195_v46 }
 0x42c   : > { %2685 = vmatprep.subr.mxu0 %v2726_v0 }
 0x42d   : > { %2686 = vmatpush3.msra.mxu0 %v2194_v63 }
 0x42e   : > { %2687 = vmatprep.subr.mxu0 %v2726_v0 }
 0x42f   : > { %2688 = vmatpush3.msra.mxu0 %v2193_v15 }
 0x430   : > { %2689 = vmatprep.subr.mxu0 %v2726_v0 }
 0x431   : > { %2690 = vmatpush3.msra.mxu0 %v2192_v16 }
 0x4e2   : > { %v2041_v41 = vpop.f32.mrf.mxu0 }
 0x4e3   : > { %v2045_v9 = vsel %vm581_vm0, %v2041_v41, 0.0 }
 0x4e4   : > { %v2046_v32 = vrot.slane %v2045_v9, 4  ;;  %v2639_v45 = vpop.f32.mrf.mxu0 }
 0x4e6   : > { %v2047_v55 = vadd.f32 %v2046_v32, %v2045_v9 }
 0x4e8   : > { %v2048_v48 = vrot.slane %v2047_v55, 2 }
 0x4ea   : > { %v2049_v13 = vadd.f32 %v2048_v48, %v2047_v55 }
 0x4ec   : > { %v2050_v49 = vrot.slane %v2049_v13, 1 }
 0x4ee   : > { %v2051_v52 = vadd.f32 %v2050_v49, %v2049_v13 }
 0x4f0   : > { %v2052_v12 = vmul.f32 0.25, %v2051_v52 }
 0x4f2   : > { %v2053_v42 = vsub.f32 %v2041_v41, %v2052_v12 }
 0x4f4   : > { %v2054_v62 = vmul.f32 %v2053_v42, %v2053_v42 }
 0x4f6   : > { %v2055_v53 = vsel %vm581_vm0, %v2054_v62, 0.0 }
 0x4f7   : > { %v2056_v56 = vrot.slane %v2055_v53, 4 }
 0x4f9   : > { %v2057_v57 = vadd.f32 %v2056_v56, %v2055_v53 }
 0x4fb   : > { %v2058_v20 = vrot.slane %v2057_v57, 2 }
 0x4fd   : > { %v2059_v59 = vadd.f32 %v2058_v20, %v2057_v57 }
 0x4ff   : > { %v2060_v39 = vrot.slane %v2059_v59, 1 }
 0x501   : > { %v2061_v30 = vadd.f32 %v2060_v39, %v2059_v59 }
 0x503   : > { %v2062_v60 = vmul.f32 0.25, %v2061_v30 }
 0x505   : > { %v2063_v61 = vadd.f32 1e-05, %v2062_v60 }
 0x507   : > { %2714 = vrsqrt.f32 %v2063_v61 }
 0x514   : > { %v2715_v1 = vpop.eup %2714 }
 0x515   : > { %v2065_v2 = vmul.f32 %v2715_v1, %v2053_v42 }
 0x517   : > { %2673 = vmatmul.mubr.f32.vlgmr.msra.gmra.mxu1 %v2065_v2  ;;  %2066 = vst [vmem:[%s499_s26] sm:$0xf] %v2065_v2 }
 0x5d7   : > { %v2149_v17 = vpop.f32.mrf.mxu1 }
 0x5d8   : > { %v2156_v43 = vsel %vm2155_vm6, %v2149_v17, 0.0 }
 0x5d9   : > { %v2157_v4 = vrot.slane %v2156_v43, 4  ;;  %v2674_v18 = vpop.f32.mrf.mxu1 }
 0x5db   : > { %v2158_v19 = vadd.f32 %v2157_v4, %v2156_v43 }
 0x5dd   : > { %v2159_v21 = vrot.slane %v2158_v19, 2 }
 0x5df   : > { %v2160_v3 = vadd.f32 %v2159_v21, %v2158_v19 }
 0x5e1   : > { %v2161_v22 = vrot.slane %v2160_v3, 1 }
 0x5e3   : > { %v2162_v50 = vadd.f32 %v2161_v22, %v2160_v3 }
 0x5e5   : > { %v2163_v23 = vmul.f32 0.25, %v2162_v50 }
 0x5e7   : > { %v2164_v24 = vsub.f32 %v2149_v17, %v2163_v23 }
 0x5e9   : > { %v2165_v6 = vmul.f32 %v2164_v24, %v2164_v24 }
 0x5eb   : > { %v2166_v25 = vsel %vm2155_vm6, %v2165_v6, 0.0 }
 0x5ec   : > { %v2167_v0 = vrot.slane %v2166_v25, 4 }
 0x5ee   : > { %v2168_v47 = vadd.f32 %v2167_v0, %v2166_v25 }
 0x5f0   : > { %v2169_v26 = vrot.slane %v2168_v47, 2 }
 0x5f2   : > { %v2170_v5 = vadd.f32 %v2169_v26, %v2168_v47 }
 0x5f4   : > { %v2171_v27 = vrot.slane %v2170_v5, 1 }
 0x5f6   : > { %v2172_v28 = vadd.f32 %v2171_v27, %v2170_v5 }
 0x5f8   : > { %v2173_v29 = vmul.f32 0.25, %v2172_v28 }
 0x5fa   : > { %v2174_v54 = vadd.f32 1e-05, %v2173_v29 }
 0x5fc   : > { %2716 = vrsqrt.f32 %v2174_v54 }
 0x609   : > { %v2717_v8 = vpop.eup %2716 }
 0x60a   : > { %v2176_v33 = vmul.f32 %v2717_v8, %v2164_v24 }
 0x60c   : > { %v2183_v7 = vmul.f32 %v2451_v31, %v2176_v33 }
 0x60e   : > { %v2190_v51 = vadd.f32 %v2452_v35, %v2183_v7 }
 0x610   : > { %v2191_v36 = vmax.f32 %v2190_v51, 0.0 }
 0x612   : > { %2692 = vmatmul.mubr.msk.f32.vlgmr.msra.gmra.mxu0 %vm2207_vm7, %v2191_v36 }
 0x6d2   : > { %v2277_v38 = vpop.f32.mrf.mxu0 }
 0x6d3   : > { %v2278_v10 = vadd.f32 %v2453_v37, %v2277_v38 }
 0x6d4   : > { %v2693_v40 = vpop.f32.mrf.mxu0 }
 0x6d5   : > { %2281 = vst [vmem:[%s503_s27] sm:$0xf] %v2278_v10 }
 0x6d6 PF: > { %s26_s18 = sadd.s32 1, %s2724_s18  }
 0x6d7   : > { %p23_p4 = scmp.ge.s32.totalorder %s26_s18, 4  }
 0x6d9   :  { %25 = sbr.rel (!%p23_p4) target bundleno = 1 (0x1), region = 118 }

</bundles_post_ra>
